<compile_context>
chip_gen: v7x
topology: tpu7x:2x2x1
jax: 0.10.0
libtpu: 0.0.40
codegen_flags: <defaults>
</compile_context>

<pallas_src>
import functools

import jax
import jax.numpy as jnp
from jax.experimental import pallas as pl
from jax.experimental.pallas import tpu as pltpu

BN_EPS = 1e-5


def _round_up(v, m):
    return ((v + m - 1) // m) * m


def _vmem_budget_and_limit():
    """Pick a scoped-VMEM limit and a tile budget from the chip's VMEM size."""
    cap = None
    try:
        info = pltpu.get_tpu_info()
        cap = getattr(info, "vmem_capacity_bytes", None)
    except Exception:
        cap = None
    if not cap:
        cap = 64 * 1024 * 1024          # conservative fallback = v7x physical VMEM
    limit = min(int(cap * 3 // 4), 96 * 1024 * 1024)   # 48 MiB on v7x, 96 MiB on v5e/v6e
    budget = int(limit * 4 // 5)                       # headroom for scratch/intermediates
    return budget, limit


def _choose_k_blk(K, T, cin, units, budget_bytes):
    """Largest voxel tile whose double-buffered lane-dense streams fit the budget."""
    lane = lambda n: _round_up(n, 128)
    per_voxel = 4 * 2 * (lane(T * cin) + lane(T) + lane(T * 2 * units))  # x, mask, out (x2 buf)
    per_voxel += 4 * 4 * 128                                             # transient row state
    k = int(budget_bytes // per_voxel)
    k = max(8, min(k, 4096))
    if k >= K:
        return K                        # single (possibly non-multiple-of-8) full block
    return max(8, (k // 8) * 8)


# ----------------------------------------------------------------------------
# Pass 1: BN moments via colsum(x) and the flat Gram matrix x^T x.
# Grid = (2 cores, tiles-per-core); outputs are per-core partials.
# ----------------------------------------------------------------------------
def vfe_moments_kernel(x_ref, colsum_ref, gram_ref, *, k_blk, k_total):
    i = pl.program_id(1)

    @pl.when(i == 0)
    def _init():
        colsum_ref[...] = jnp.zeros_like(colsum_ref)
        gram_ref[...] = jnp.zeros_like(gram_ref)

    kb = x_ref.shape[0]
    # Global voxel index of this tile's first row (the x index_map clamps the
    # DMA to a valid block; phantom / boundary rows are zeroed here so the
    # moments stay exact without any wrapper-side padding).
    start = (pl.program_id(0) * pl.num_programs(1) + i) * k_blk
    rows = jax.lax.broadcasted_iota(jnp.int32, (kb, 1), 0)
    xb = jnp.where(start + rows < k_total, x_ref[...], 0.0)          # (kb, T*cin)

    colsum_ref[...] += jnp.sum(xb, axis=0, keepdims=True)            # (1, T*cin)
    gram_ref[...] += jax.lax.dot_general(                            # (T*cin, T*cin)
        xb, xb, (((0,), (0,)), ((), ())), preferred_element_type=jnp.float32)


# ----------------------------------------------------------------------------
# Pass 2: y = x@Wscaled + shift, ReLU, max-over-T, mask, dense store.
# All blocks are lane-dense 2-D; per-t slices stay inside VMEM.
# ----------------------------------------------------------------------------
def vfe_apply_kernel(x_ref, mask_ref, w_ref, shift_ref, out_ref, *, t_pts, cin, units):
    kb = x_ref.shape[0]
    u2 = 2 * units
    w = w_ref[...]                                                    # (cin, U), scale folded in
    shift = shift_ref[...]                                            # (1, U)

    laf = jnp.zeros((kb, units), jnp.float32)                         # relu >= 0 -> 0 is max identity
    for t in range(t_pts):
        x_t = x_ref[:, t * cin:(t + 1) * cin]                         # (kb, cin)
        p_t = jnp.maximum(
            jnp.dot(x_t, w, preferred_element_type=jnp.float32) + shift, 0.0)
        m_t = mask_ref[:, t:t + 1]                                    # (kb, 1)
        out_ref[:, t * u2:t * u2 + units] = p_t * m_t                 # point-wise features
        laf = jnp.maximum(laf, p_t)                                   # running max over T

    for t in range(t_pts):
        m_t = mask_ref[:, t:t + 1]
        out_ref[:, t * u2 + units:(t + 1) * u2] = laf * m_t           # aggregated features


def vfe_forward(x, mask, w_t, b, gamma, beta, *, k_blk=None):
    """x: (K, T, cin) f32, mask: (K, T) 0/1, w_t: (cin, U), b/gamma/beta: (1, U)."""
    del b  # linear bias cancels exactly under training-mode BatchNorm
    K, T, cin = x.shape
    U = w_t.shape[1]
    Tc = T * cin
    To = T * 2 * U

    budget, vmem_limit = _vmem_budget_and_limit()
    if k_blk is None:
        k_blk = _choose_k_blk(K, T, cin, U, budget)
    else:
        k_blk = max(1, min(int(k_blk), K))
        if k_blk != K:
            k_blk = max(8, (k_blk // 8) * 8)          # keep (8,·) divisibility when tiled
    num_tiles = pl.cdiv(K, k_blk)

    x2 = x.reshape(K, Tc)                              # free trailing-dim merge
    mask2 = mask.astype(jnp.float32)                   # (K, T)

    # ---- Pass 1: global BN moments (two per-core partials, reduced here) ----
    half = pl.cdiv(num_tiles, 2)
    x_spec_p1 = pl.BlockSpec(
        (k_blk, Tc),
        lambda c, i: (jnp.minimum(c * half + i, num_tiles - 1), 0))

    colsum, gram = pl.pallas_call(
        functools.partial(vfe_moments_kernel, k_blk=k_blk, k_total=K),
        out_shape=(jax.ShapeDtypeStruct((2, 1, Tc), jnp.float32),
                   jax.ShapeDtypeStruct((2, Tc, Tc), jnp.float32)),
        grid=(2, half),
        in_specs=[x_spec_p1],
        out_specs=(pl.BlockSpec((None, 1, Tc), lambda c, i: (c, 0, 0)),
                   pl.BlockSpec((None, Tc, Tc), lambda c, i: (c, 0, 0))),
        compiler_params=pltpu.CompilerParams(
            dimension_semantics=("parallel", "arbitrary"),
            vmem_limit_bytes=vmem_limit),
    )(x2)

    n = jnp.float32(K * T)
    csum = jnp.sum(colsum, axis=0).reshape(T, cin).sum(axis=0)        # (cin,)
    Gf = jnp.sum(gram, axis=0).reshape(T, cin, T, cin)
    G = sum(Gf[t, :, t, :] for t in range(T))                         # (cin, cin) diag blocks
    mean = (csum @ w_t) / n                                           # (U,)
    ey2 = jnp.sum((G @ w_t) * w_t, axis=0) / n                        # (U,)  diag(W^T G W)/n
    var = jnp.maximum(ey2 - mean * mean, 0.0)                         # biased variance
    scale = gamma[0] * jax.lax.rsqrt(var + BN_EPS)                    # (U,)
    shift = (beta[0] - mean * scale)[None, :]                         # (1, U)
    w_scaled = w_t * scale[None, :]                                   # fold BN scale into W

    # ---- Pass 2: apply, max-over-T, mask; streamed over K tiles --------------
    out2 = pl.pallas_call(
        functools.partial(vfe_apply_kernel, t_pts=T, cin=cin, units=U),
        out_shape=jax.ShapeDtypeStruct((K, To), jnp.float32),
        grid=(num_tiles,),
        in_specs=[pl.BlockSpec((k_blk, Tc), lambda i: (i, 0)),
                  pl.BlockSpec((k_blk, T), lambda i: (i, 0)),
                  pl.BlockSpec((cin, U), lambda i: (0, 0)),           # resident
                  pl.BlockSpec((1, U), lambda i: (0, 0))],            # resident
        out_specs=pl.BlockSpec((k_blk, To), lambda i: (i, 0)),
        compiler_params=pltpu.CompilerParams(
            dimension_semantics=("parallel",),
            vmem_limit_bytes=vmem_limit),
    )(x2, mask2, w_scaled, shift)

    return out2.reshape(K, T, 2 * U)                                  # free trailing split


def vfe_reference(x, mask, w_t, b, gamma, beta):
    """Pure-JAX reference mirroring the PyTorch forward (bias + two-pass BN)."""
    K, T, cin = x.shape
    U = w_t.shape[1]
    y = x.reshape(K * T, cin) @ w_t + b[0]
    mean = jnp.mean(y, axis=0)
    var = jnp.mean((y - mean) ** 2, axis=0)
    y = (y - mean) / jnp.sqrt(var + BN_EPS) * gamma[0] + beta[0]
    pwf = jnp.maximum(y, 0.0).reshape(K, T, U)
    laf = jnp.broadcast_to(jnp.max(pwf, axis=1, keepdims=True), pwf.shape)
    pwcf = jnp.concatenate([pwf, laf], axis=-1)
    return pwcf * mask[:, :, None]


if __name__ == "__main__":
    # Small shapes consistent with the module (VFE-1-like odd dims):
    # K voxels, T points/voxel, cin input features, cout = 2 * units output.
    # K deliberately not a multiple of the tile so the boundary block and the
    # megacore phantom tile are exercised.
    K, T, CIN, COUT = 50, 10, 7, 32
    UNITS = COUT // 2

    key = jax.random.PRNGKey(0)
    kx, km, kw, kb_, kg, kbt = jax.random.split(key, 6)

    x = jax.random.normal(kx, (K, T, CIN), dtype=jnp.float32)
    mask = jax.random.bernoulli(km, p=0.7, shape=(K, T)).astype(jnp.float32)

    # PyTorch Linear weight is (out, in); the kernel takes it transposed.
    w = jax.random.normal(kw, (UNITS, CIN), dtype=jnp.float32) * 0.1
    w_t = w.T
    b = jax.random.normal(kb_, (1, UNITS), dtype=jnp.float32) * 0.1
    gamma = 1.0 + 0.1 * jax.random.normal(kg, (1, UNITS), dtype=jnp.float32)
    beta = 0.1 * jax.random.normal(kbt, (1, UNITS), dtype=jnp.float32)

    ref = vfe_reference(x, mask, w_t, b, gamma, beta)
    run = jax.jit(vfe_forward, static_argnames=("k_blk",))

    # Multi-tile path: k_blk=16 -> 4 tiles, partial boundary block of 2 voxels.
    out_tiled = jax.block_until_ready(run(x, mask, w_t, b, gamma, beta, k_blk=16))
    assert out_tiled.shape == (K, T, COUT)
    assert jnp.allclose(out_tiled, ref, rtol=1e-4, atol=1e-4), \
        float(jnp.max(jnp.abs(out_tiled - ref)))

    # Auto-sized path (single full block at this small K).
    out_auto = jax.block_until_ready(run(x, mask, w_t, b, gamma, beta))
    assert jnp.allclose(out_auto, ref, rtol=1e-4, atol=1e-4), \
        float(jnp.max(jnp.abs(out_auto - ref)))

    print("KERNEL_OK")
</pallas_src>

<mosaic_0001>
module attributes {stable_mosaic.version = 11 : i64} {
  func.func @vfe_moments_kernel(%arg0: i32, %arg1: i32, %arg2: memref<16x70xf32, #tpu.memory_space<vmem>>, %arg3: memref<1x1x70xf32, #tpu.memory_space<vmem>>, %arg4: memref<1x70x70xf32, #tpu.memory_space<vmem>>) attributes {dimension_semantics = [#tpu.dimension_semantics<parallel>, #tpu.dimension_semantics<arbitrary>], iteration_bounds = array<i64: 2, 2>, scalar_prefetch = 0 : i64, scratch_operands = 0 : i64, tpu.core_type = #tpu.core_type<tc>, window_params = [{transform_indices = @transform_0, window_bounds = array<i64: 16, 70>}, {transform_indices = @transform_1, window_bounds = array<i64: 1, 1, 70>}, {transform_indices = @transform_2, window_bounds = array<i64: 1, 70, 70>}]} {
    %c0_i32 = arith.constant 0 : i32
    %0 = arith.cmpi eq, %arg1, %c0_i32 : i32
    %1 = arith.extui %0 : i1 to i32
    %c0_i32_0 = arith.constant 0 : i32
    %2 = arith.cmpi ne, %1, %c0_i32_0 : i32
    scf.if %2 {
      %cst_16 = arith.constant 0.000000e+00 : f32
      %31 = vector.broadcast %cst_16 : f32 to vector<1x70xf32>
      %c0_17 = arith.constant 0 : index
      %c0_18 = arith.constant 0 : index
      %c0_19 = arith.constant 0 : index
      %32 = vector.load %arg3[%c0_17, %c0_18, %c0_19] : memref<1x1x70xf32, #tpu.memory_space<vmem>>, vector<1x1x70xf32>
      %33 = vector.shape_cast %32 : vector<1x1x70xf32> to vector<1x70xf32>
      %34 = vector.shape_cast %31 : vector<1x70xf32> to vector<1x1x70xf32>
      tpu.vector_store %arg3[%c0_17, %c0_18, %c0_19], %34 {strides = array<i32>} : memref<1x1x70xf32, #tpu.memory_space<vmem>>, vector<1x1x70xf32>,
      %cst_20 = arith.constant 0.000000e+00 : f32
      %35 = vector.broadcast %cst_20 : f32 to vector<70x70xf32>
      %c0_21 = arith.constant 0 : index
      %c0_22 = arith.constant 0 : index
      %c0_23 = arith.constant 0 : index
      %36 = vector.load %arg4[%c0_21, %c0_22, %c0_23] : memref<1x70x70xf32, #tpu.memory_space<vmem>>, vector<1x70x70xf32>
      %37 = vector.shape_cast %36 : vector<1x70x70xf32> to vector<70x70xf32>
      %38 = vector.shape_cast %35 : vector<70x70xf32> to vector<1x70x70xf32>
      tpu.vector_store %arg4[%c0_21, %c0_22, %c0_23], %38 {strides = array<i32>} : memref<1x70x70xf32, #tpu.memory_space<vmem>>, vector<1x70x70xf32>,
    } else {
    }
    %c2_i32 = arith.constant 2 : i32
    %3 = arith.muli %arg0, %c2_i32 : i32
    %4 = arith.addi %3, %arg1 : i32
    %c16_i32 = arith.constant 16 : i32
    %5 = arith.muli %4, %c16_i32 : i32
    %6 = tpu.iota {dimensions = array<i32: 0>} : vector<16x1xi32>
    %7 = vector.broadcast %5 : i32 to vector<16x1xi32>
    %8 = arith.addi %7, %6 : vector<16x1xi32>
    %c50_i32 = arith.constant 50 : i32
    %9 = vector.broadcast %c50_i32 : i32 to vector<16x1xi32>
    %10 = arith.cmpi slt, %8, %9 : vector<16x1xi32>
    %c0 = arith.constant 0 : index
    %c0_1 = arith.constant 0 : index
    %11 = vector.load %arg2[%c0, %c0_1] : memref<16x70xf32, #tpu.memory_space<vmem>>, vector<16x70xf32>
    %cst = arith.constant 0.000000e+00 : f32
    %12 = vector.shape_cast %10 : vector<16x1xi1> to vector<16x1xi1>
    %13 = vector.broadcast %12 : vector<16x1xi1> to vector<16x70xi1>
    %14 = vector.broadcast %cst : f32 to vector<16x70xf32>
    %15 = arith.select %13, %11, %14 : vector<16x70xi1>, vector<16x70xf32>
    %c0_2 = arith.constant 0 : index
    %c0_3 = arith.constant 0 : index
    %c0_4 = arith.constant 0 : index
    %16 = vector.load %arg3[%c0_2, %c0_3, %c0_4] : memref<1x1x70xf32, #tpu.memory_space<vmem>>, vector<1x1x70xf32>
    %17 = vector.shape_cast %16 : vector<1x1x70xf32> to vector<1x70xf32>
    %cst_5 = arith.constant dense<0.000000e+00> : vector<70xf32>
    %18 = vector.multi_reduction <add>, %15, %cst_5 [0] : vector<16x70xf32> to vector<70xf32>
    %19 = vector.shape_cast %18 : vector<70xf32> to vector<1x70xf32>
    %20 = arith.addf %17, %19 : vector<1x70xf32>
    %c0_6 = arith.constant 0 : index
    %c0_7 = arith.constant 0 : index
    %c0_8 = arith.constant 0 : index
    %21 = vector.load %arg3[%c0_6, %c0_7, %c0_8] : memref<1x1x70xf32, #tpu.memory_space<vmem>>, vector<1x1x70xf32>
    %22 = vector.shape_cast %21 : vector<1x1x70xf32> to vector<1x70xf32>
    %23 = vector.shape_cast %20 : vector<1x70xf32> to vector<1x1x70xf32>
    tpu.vector_store %arg3[%c0_6, %c0_7, %c0_8], %23 {strides = array<i32>} : memref<1x1x70xf32, #tpu.memory_space<vmem>>, vector<1x1x70xf32>,
    %c0_9 = arith.constant 0 : index
    %c0_10 = arith.constant 0 : index
    %c0_11 = arith.constant 0 : index
    %24 = vector.load %arg4[%c0_9, %c0_10, %c0_11] : memref<1x70x70xf32, #tpu.memory_space<vmem>>, vector<1x70x70xf32>
    %25 = vector.shape_cast %24 : vector<1x70x70xf32> to vector<70x70xf32>
    %cst_12 = arith.constant dense<0.000000e+00> : vector<70x70xf32>
    %26 = tpu.matmul %15, %15, %cst_12 {dimension_numbers = #tpu.dot_dimension_numbers<[0], [0], [1], [1], [0, 1, 1, 1], [], []>} : vector<16x70xf32>, vector<16x70xf32>, vector<70x70xf32> -> vector<70x70xf32>
    %27 = arith.addf %25, %26 : vector<70x70xf32>
    %c0_13 = arith.constant 0 : index
    %c0_14 = arith.constant 0 : index
    %c0_15 = arith.constant 0 : index
    %28 = vector.load %arg4[%c0_13, %c0_14, %c0_15] : memref<1x70x70xf32, #tpu.memory_space<vmem>>, vector<1x70x70xf32>
    %29 = vector.shape_cast %28 : vector<1x70x70xf32> to vector<70x70xf32>
    %30 = vector.shape_cast %27 : vector<70x70xf32> to vector<1x70x70xf32>
    tpu.vector_store %arg4[%c0_13, %c0_14, %c0_15], %30 {strides = array<i32>} : memref<1x70x70xf32, #tpu.memory_space<vmem>>, vector<1x70x70xf32>,
    return
  }
  func.func @transform_0(%arg0: i32, %arg1: i32) -> (i32, i32) {
    %c2_i32 = arith.constant 2 : i32
    %0 = arith.muli %arg0, %c2_i32 : i32
    %1 = arith.addi %0, %arg1 : i32
    %c3_i32 = arith.constant 3 : i32
    %2 = arith.minsi %1, %c3_i32 : i32
    %c0_i32 = arith.constant 0 : i32
    %c0_i32_0 = arith.constant 0 : i32
    return %2, %c0_i32 : i32, i32
  }
  func.func @transform_1(%arg0: i32, %arg1: i32) -> (i32, i32, i32) {
    %c0_i32 = arith.constant 0 : i32
    %c0_i32_0 = arith.constant 0 : i32
    %c0_i32_1 = arith.constant 0 : i32
    return %arg0, %c0_i32, %c0_i32_0 : i32, i32, i32
  }
  func.func @transform_2(%arg0: i32, %arg1: i32) -> (i32, i32, i32) {
    %c0_i32 = arith.constant 0 : i32
    %c0_i32_0 = arith.constant 0 : i32
    %c0_i32_1 = arith.constant 0 : i32
    return %arg0, %c0_i32, %c0_i32_0 : i32, i32, i32
  }
}

module attributes {stable_mosaic.version = 11 : i64} {
  func.func @vfe_apply_kernel(%arg0: i32, %arg1: memref<16x70xf32, #tpu.memory_space<vmem>>, %arg2: memref<16x10xf32, #tpu.memory_space<vmem>>, %arg3: memref<7x16xf32, #tpu.memory_space<vmem>>, %arg4: memref<1x16xf32, #tpu.memory_space<vmem>>, %arg5: memref<16x320xf32, #tpu.memory_space<vmem>>) attributes {dimension_semantics = [#tpu.dimension_semantics<parallel>], iteration_bounds = array<i64: 4>, scalar_prefetch = 0 : i64, scratch_operands = 0 : i64, tpu.core_type = #tpu.core_type<tc>, window_params = [{transform_indices = @transform_0, window_bounds = array<i64: 16, 70>}, {transform_indices = @transform_1, window_bounds = array<i64: 16, 10>}, {pipeline_mode = #tpu.pipeline_mode<synchronous>, transform_indices = @transform_2, window_bounds = array<i64: 7, 16>}, {pipeline_mode = #tpu.pipeline_mode<synchronous>, transform_indices = @transform_3, window_bounds = array<i64: 1, 16>}, {transform_indices = @transform_4, window_bounds = array<i64: 16, 320>}]} {
    %c0 = arith.constant 0 : index
    %c0_0 = arith.constant 0 : index
    %0 = vector.load %arg3[%c0, %c0_0] : memref<7x16xf32, #tpu.memory_space<vmem>>, vector<7x16xf32>
    %c0_1 = arith.constant 0 : index
    %c0_2 = arith.constant 0 : index
    %1 = vector.load %arg4[%c0_1, %c0_2] : memref<1x16xf32, #tpu.memory_space<vmem>>, vector<1x16xf32>
    %cst = arith.constant 0.000000e+00 : f32
    %2 = vector.broadcast %cst : f32 to vector<16x16xf32>
    %c0_3 = arith.constant 0 : index
    %c0_4 = arith.constant 0 : index
    %3 = vector.load %arg1[%c0_3, %c0_4] : memref<16x70xf32, #tpu.memory_space<vmem>>, vector<16x7xf32>
    %cst_5 = arith.constant dense<0.000000e+00> : vector<16x16xf32>
    %4 = tpu.matmul %3, %0, %cst_5 {dimension_numbers = #tpu.dot_dimension_numbers<[1], [0], [0], [1], [0, 0, 1, 1], [], []>} : vector<16x7xf32>, vector<7x16xf32>, vector<16x16xf32> -> vector<16x16xf32>
    %5 = vector.broadcast %1 : vector<1x16xf32> to vector<16x16xf32>
    %6 = arith.addf %4, %5 : vector<16x16xf32>
    %cst_6 = arith.constant 0.000000e+00 : f32
    %7 = vector.broadcast %cst_6 : f32 to vector<16x16xf32>
    %8 = arith.maximumf %6, %7 : vector<16x16xf32>
    %c0_7 = arith.constant 0 : index
    %c0_8 = arith.constant 0 : index
    %9 = vector.load %arg2[%c0_7, %c0_8] : memref<16x10xf32, #tpu.memory_space<vmem>>, vector<16x1xf32>
    %10 = vector.broadcast %9 : vector<16x1xf32> to vector<16x16xf32>
    %11 = arith.mulf %8, %10 : vector<16x16xf32>
    %c0_9 = arith.constant 0 : index
    %c0_10 = arith.constant 0 : index
    %12 = vector.load %arg5[%c0_9, %c0_10] : memref<16x320xf32, #tpu.memory_space<vmem>>, vector<16x16xf32>
    tpu.vector_store %arg5[%c0_9, %c0_10], %11 {strides = array<i32>} : memref<16x320xf32, #tpu.memory_space<vmem>>, vector<16x16xf32>,
    %13 = arith.maximumf %2, %8 : vector<16x16xf32>
    %c0_11 = arith.constant 0 : index
    %c7 = arith.constant 7 : index
    %14 = vector.load %arg1[%c0_11, %c7] : memref<16x70xf32, #tpu.memory_space<vmem>>, vector<16x7xf32>
    %cst_12 = arith.constant dense<0.000000e+00> : vector<16x16xf32>
    %15 = tpu.matmul %14, %0, %cst_12 {dimension_numbers = #tpu.dot_dimension_numbers<[1], [0], [0], [1], [0, 0, 1, 1], [], []>} : vector<16x7xf32>, vector<7x16xf32>, vector<16x16xf32> -> vector<16x16xf32>
    %16 = vector.broadcast %1 : vector<1x16xf32> to vector<16x16xf32>
    %17 = arith.addf %15, %16 : vector<16x16xf32>
    %cst_13 = arith.constant 0.000000e+00 : f32
    %18 = vector.broadcast %cst_13 : f32 to vector<16x16xf32>
    %19 = arith.maximumf %17, %18 : vector<16x16xf32>
    %c0_14 = arith.constant 0 : index
    %c1 = arith.constant 1 : index
    %20 = vector.load %arg2[%c0_14, %c1] : memref<16x10xf32, #tpu.memory_space<vmem>>, vector<16x1xf32>
    %21 = vector.broadcast %20 : vector<16x1xf32> to vector<16x16xf32>
    %22 = arith.mulf %19, %21 : vector<16x16xf32>
    %c0_15 = arith.constant 0 : index
    %c32 = arith.constant 32 : index
    %23 = vector.load %arg5[%c0_15, %c32] : memref<16x320xf32, #tpu.memory_space<vmem>>, vector<16x16xf32>
    tpu.vector_store %arg5[%c0_15, %c32], %22 {strides = array<i32>} : memref<16x320xf32, #tpu.memory_space<vmem>>, vector<16x16xf32>,
    %24 = arith.maximumf %13, %19 : vector<16x16xf32>
    %c0_16 = arith.constant 0 : index
    %c14 = arith.constant 14 : index
    %25 = vector.load %arg1[%c0_16, %c14] : memref<16x70xf32, #tpu.memory_space<vmem>>, vector<16x7xf32>
    %cst_17 = arith.constant dense<0.000000e+00> : vector<16x16xf32>
    %26 = tpu.matmul %25, %0, %cst_17 {dimension_numbers = #tpu.dot_dimension_numbers<[1], [0], [0], [1], [0, 0, 1, 1], [], []>} : vector<16x7xf32>, vector<7x16xf32>, vector<16x16xf32> -> vector<16x16xf32>
    %27 = vector.broadcast %1 : vector<1x16xf32> to vector<16x16xf32>
    %28 = arith.addf %26, %27 : vector<16x16xf32>
    %cst_18 = arith.constant 0.000000e+00 : f32
    %29 = vector.broadcast %cst_18 : f32 to vector<16x16xf32>
    %30 = arith.maximumf %28, %29 : vector<16x16xf32>
    %c0_19 = arith.constant 0 : index
    %c2 = arith.constant 2 : index
    %31 = vector.load %arg2[%c0_19, %c2] : memref<16x10xf32, #tpu.memory_space<vmem>>, vector<16x1xf32>
    %32 = vector.broadcast %31 : vector<16x1xf32> to vector<16x16xf32>
    %33 = arith.mulf %30, %32 : vector<16x16xf32>
    %c0_20 = arith.constant 0 : index
    %c64 = arith.constant 64 : index
    %34 = vector.load %arg5[%c0_20, %c64] : memref<16x320xf32, #tpu.memory_space<vmem>>, vector<16x16xf32>
    tpu.vector_store %arg5[%c0_20, %c64], %33 {strides = array<i32>} : memref<16x320xf32, #tpu.memory_space<vmem>>, vector<16x16xf32>,
    %35 = arith.maximumf %24, %30 : vector<16x16xf32>
    %c0_21 = arith.constant 0 : index
    %c21 = arith.constant 21 : index
    %36 = vector.load %arg1[%c0_21, %c21] : memref<16x70xf32, #tpu.memory_space<vmem>>, vector<16x7xf32>
    %cst_22 = arith.constant dense<0.000000e+00> : vector<16x16xf32>
    %37 = tpu.matmul %36, %0, %cst_22 {dimension_numbers = #tpu.dot_dimension_numbers<[1], [0], [0], [1], [0, 0, 1, 1], [], []>} : vector<16x7xf32>, vector<7x16xf32>, vector<16x16xf32> -> vector<16x16xf32>
    %38 = vector.broadcast %1 : vector<1x16xf32> to vector<16x16xf32>
    %39 = arith.addf %37, %38 : vector<16x16xf32>
    %cst_23 = arith.constant 0.000000e+00 : f32
    %40 = vector.broadcast %cst_23 : f32 to vector<16x16xf32>
    %41 = arith.maximumf %39, %40 : vector<16x16xf32>
    %c0_24 = arith.constant 0 : index
    %c3 = arith.constant 3 : index
    %42 = vector.load %arg2[%c0_24, %c3] : memref<16x10xf32, #tpu.memory_space<vmem>>, vector<16x1xf32>
    %43 = vector.broadcast %42 : vector<16x1xf32> to vector<16x16xf32>
    %44 = arith.mulf %41, %43 : vector<16x16xf32>
    %c0_25 = arith.constant 0 : index
    %c96 = arith.constant 96 : index
    %45 = vector.load %arg5[%c0_25, %c96] : memref<16x320xf32, #tpu.memory_space<vmem>>, vector<16x16xf32>
    tpu.vector_store %arg5[%c0_25, %c96], %44 {strides = array<i32>} : memref<16x320xf32, #tpu.memory_space<vmem>>, vector<16x16xf32>,
    %46 = arith.maximumf %35, %41 : vector<16x16xf32>
    %c0_26 = arith.constant 0 : index
    %c28 = arith.constant 28 : index
    %47 = vector.load %arg1[%c0_26, %c28] : memref<16x70xf32, #tpu.memory_space<vmem>>, vector<16x7xf32>
    %cst_27 = arith.constant dense<0.000000e+00> : vector<16x16xf32>
    %48 = tpu.matmul %47, %0, %cst_27 {dimension_numbers = #tpu.dot_dimension_numbers<[1], [0], [0], [1], [0, 0, 1, 1], [], []>} : vector<16x7xf32>, vector<7x16xf32>, vector<16x16xf32> -> vector<16x16xf32>
    %49 = vector.broadcast %1 : vector<1x16xf32> to vector<16x16xf32>
    %50 = arith.addf %48, %49 : vector<16x16xf32>
    %cst_28 = arith.constant 0.000000e+00 : f32
    %51 = vector.broadcast %cst_28 : f32 to vector<16x16xf32>
    %52 = arith.maximumf %50, %51 : vector<16x16xf32>
    %c0_29 = arith.constant 0 : index
    %c4 = arith.constant 4 : index
    %53 = vector.load %arg2[%c0_29, %c4] : memref<16x10xf32, #tpu.memory_space<vmem>>, vector<16x1xf32>
    %54 = vector.broadcast %53 : vector<16x1xf32> to vector<16x16xf32>
    %55 = arith.mulf %52, %54 : vector<16x16xf32>
    %c0_30 = arith.constant 0 : index
    %c128 = arith.constant 128 : index
    %56 = vector.load %arg5[%c0_30, %c128] : memref<16x320xf32, #tpu.memory_space<vmem>>, vector<16x16xf32>
    tpu.vector_store %arg5[%c0_30, %c128], %55 {strides = array<i32>} : memref<16x320xf32, #tpu.memory_space<vmem>>, vector<16x16xf32>,
    %57 = arith.maximumf %46, %52 : vector<16x16xf32>
    %c0_31 = arith.constant 0 : index
    %c35 = arith.constant 35 : index
    %58 = vector.load %arg1[%c0_31, %c35] : memref<16x70xf32, #tpu.memory_space<vmem>>, vector<16x7xf32>
    %cst_32 = arith.constant dense<0.000000e+00> : vector<16x16xf32>
    %59 = tpu.matmul %58, %0, %cst_32 {dimension_numbers = #tpu.dot_dimension_numbers<[1], [0], [0], [1], [0, 0, 1, 1], [], []>} : vector<16x7xf32>, vector<7x16xf32>, vector<16x16xf32> -> vector<16x16xf32>
    %60 = vector.broadcast %1 : vector<1x16xf32> to vector<16x16xf32>
    %61 = arith.addf %59, %60 : vector<16x16xf32>
    %cst_33 = arith.constant 0.000000e+00 : f32
    %62 = vector.broadcast %cst_33 : f32 to vector<16x16xf32>
    %63 = arith.maximumf %61, %62 : vector<16x16xf32>
    %c0_34 = arith.constant 0 : index
    %c5 = arith.constant 5 : index
    %64 = vector.load %arg2[%c0_34, %c5] : memref<16x10xf32, #tpu.memory_space<vmem>>, vector<16x1xf32>
    %65 = vector.broadcast %64 : vector<16x1xf32> to vector<16x16xf32>
    %66 = arith.mulf %63, %65 : vector<16x16xf32>
    %c0_35 = arith.constant 0 : index
    %c160 = arith.constant 160 : index
    %67 = vector.load %arg5[%c0_35, %c160] : memref<16x320xf32, #tpu.memory_space<vmem>>, vector<16x16xf32>
    tpu.vector_store %arg5[%c0_35, %c160], %66 {strides = array<i32>} : memref<16x320xf32, #tpu.memory_space<vmem>>, vector<16x16xf32>,
    %68 = arith.maximumf %57, %63 : vector<16x16xf32>
    %c0_36 = arith.constant 0 : index
    %c42 = arith.constant 42 : index
    %69 = vector.load %arg1[%c0_36, %c42] : memref<16x70xf32, #tpu.memory_space<vmem>>, vector<16x7xf32>
    %cst_37 = arith.constant dense<0.000000e+00> : vector<16x16xf32>
    %70 = tpu.matmul %69, %0, %cst_37 {dimension_numbers = #tpu.dot_dimension_numbers<[1], [0], [0], [1], [0, 0, 1, 1], [], []>} : vector<16x7xf32>, vector<7x16xf32>, vector<16x16xf32> -> vector<16x16xf32>
    %71 = vector.broadcast %1 : vector<1x16xf32> to vector<16x16xf32>
    %72 = arith.addf %70, %71 : vector<16x16xf32>
    %cst_38 = arith.constant 0.000000e+00 : f32
    %73 = vector.broadcast %cst_38 : f32 to vector<16x16xf32>
    %74 = arith.maximumf %72, %73 : vector<16x16xf32>
    %c0_39 = arith.constant 0 : index
    %c6 = arith.constant 6 : index
    %75 = vector.load %arg2[%c0_39, %c6] : memref<16x10xf32, #tpu.memory_space<vmem>>, vector<16x1xf32>
    %76 = vector.broadcast %75 : vector<16x1xf32> to vector<16x16xf32>
    %77 = arith.mulf %74, %76 : vector<16x16xf32>
    %c0_40 = arith.constant 0 : index
    %c192 = arith.constant 192 : index
    %78 = vector.load %arg5[%c0_40, %c192] : memref<16x320xf32, #tpu.memory_space<vmem>>, vector<16x16xf32>
    tpu.vector_store %arg5[%c0_40, %c192], %77 {strides = array<i32>} : memref<16x320xf32, #tpu.memory_space<vmem>>, vector<16x16xf32>,
    %79 = arith.maximumf %68, %74 : vector<16x16xf32>
    %c0_41 = arith.constant 0 : index
    %c49 = arith.constant 49 : index
    %80 = vector.load %arg1[%c0_41, %c49] : memref<16x70xf32, #tpu.memory_space<vmem>>, vector<16x7xf32>
    %cst_42 = arith.constant dense<0.000000e+00> : vector<16x16xf32>
    %81 = tpu.matmul %80, %0, %cst_42 {dimension_numbers = #tpu.dot_dimension_numbers<[1], [0], [0], [1], [0, 0, 1, 1], [], []>} : vector<16x7xf32>, vector<7x16xf32>, vector<16x16xf32> -> vector<16x16xf32>
    %82 = vector.broadcast %1 : vector<1x16xf32> to vector<16x16xf32>
    %83 = arith.addf %81, %82 : vector<16x16xf32>
    %cst_43 = arith.constant 0.000000e+00 : f32
    %84 = vector.broadcast %cst_43 : f32 to vector<16x16xf32>
    %85 = arith.maximumf %83, %84 : vector<16x16xf32>
    %c0_44 = arith.constant 0 : index
    %c7_45 = arith.constant 7 : index
    %86 = vector.load %arg2[%c0_44, %c7_45] : memref<16x10xf32, #tpu.memory_space<vmem>>, vector<16x1xf32>
    %87 = vector.broadcast %86 : vector<16x1xf32> to vector<16x16xf32>
    %88 = arith.mulf %85, %87 : vector<16x16xf32>
    %c0_46 = arith.constant 0 : index
    %c224 = arith.constant 224 : index
    %89 = vector.load %arg5[%c0_46, %c224] : memref<16x320xf32, #tpu.memory_space<vmem>>, vector<16x16xf32>
    tpu.vector_store %arg5[%c0_46, %c224], %88 {strides = array<i32>} : memref<16x320xf32, #tpu.memory_space<vmem>>, vector<16x16xf32>,
    %90 = arith.maximumf %79, %85 : vector<16x16xf32>
    %c0_47 = arith.constant 0 : index
    %c56 = arith.constant 56 : index
    %91 = vector.load %arg1[%c0_47, %c56] : memref<16x70xf32, #tpu.memory_space<vmem>>, vector<16x7xf32>
    %cst_48 = arith.constant dense<0.000000e+00> : vector<16x16xf32>
    %92 = tpu.matmul %91, %0, %cst_48 {dimension_numbers = #tpu.dot_dimension_numbers<[1], [0], [0], [1], [0, 0, 1, 1], [], []>} : vector<16x7xf32>, vector<7x16xf32>, vector<16x16xf32> -> vector<16x16xf32>
    %93 = vector.broadcast %1 : vector<1x16xf32> to vector<16x16xf32>
    %94 = arith.addf %92, %93 : vector<16x16xf32>
    %cst_49 = arith.constant 0.000000e+00 : f32
    %95 = vector.broadcast %cst_49 : f32 to vector<16x16xf32>
    %96 = arith.maximumf %94, %95 : vector<16x16xf32>
    %c0_50 = arith.constant 0 : index
    %c8 = arith.constant 8 : index
    %97 = vector.load %arg2[%c0_50, %c8] : memref<16x10xf32, #tpu.memory_space<vmem>>, vector<16x1xf32>
    %98 = vector.broadcast %97 : vector<16x1xf32> to vector<16x16xf32>
    %99 = arith.mulf %96, %98 : vector<16x16xf32>
    %c0_51 = arith.constant 0 : index
    %c256 = arith.constant 256 : index
    %100 = vector.load %arg5[%c0_51, %c256] : memref<16x320xf32, #tpu.memory_space<vmem>>, vector<16x16xf32>
    tpu.vector_store %arg5[%c0_51, %c256], %99 {strides = array<i32>} : memref<16x320xf32, #tpu.memory_space<vmem>>, vector<16x16xf32>,
    %101 = arith.maximumf %90, %96 : vector<16x16xf32>
    %c0_52 = arith.constant 0 : index
    %c63 = arith.constant 63 : index
    %102 = vector.load %arg1[%c0_52, %c63] : memref<16x70xf32, #tpu.memory_space<vmem>>, vector<16x7xf32>
    %cst_53 = arith.constant dense<0.000000e+00> : vector<16x16xf32>
    %103 = tpu.matmul %102, %0, %cst_53 {dimension_numbers = #tpu.dot_dimension_numbers<[1], [0], [0], [1], [0, 0, 1, 1], [], []>} : vector<16x7xf32>, vector<7x16xf32>, vector<16x16xf32> -> vector<16x16xf32>
    %104 = vector.broadcast %1 : vector<1x16xf32> to vector<16x16xf32>
    %105 = arith.addf %103, %104 : vector<16x16xf32>
    %cst_54 = arith.constant 0.000000e+00 : f32
    %106 = vector.broadcast %cst_54 : f32 to vector<16x16xf32>
    %107 = arith.maximumf %105, %106 : vector<16x16xf32>
    %c0_55 = arith.constant 0 : index
    %c9 = arith.constant 9 : index
    %108 = vector.load %arg2[%c0_55, %c9] : memref<16x10xf32, #tpu.memory_space<vmem>>, vector<16x1xf32>
    %109 = vector.broadcast %108 : vector<16x1xf32> to vector<16x16xf32>
    %110 = arith.mulf %107, %109 : vector<16x16xf32>
    %c0_56 = arith.constant 0 : index
    %c288 = arith.constant 288 : index
    %111 = vector.load %arg5[%c0_56, %c288] : memref<16x320xf32, #tpu.memory_space<vmem>>, vector<16x16xf32>
    tpu.vector_store %arg5[%c0_56, %c288], %110 {strides = array<i32>} : memref<16x320xf32, #tpu.memory_space<vmem>>, vector<16x16xf32>,
    %112 = arith.maximumf %101, %107 : vector<16x16xf32>
    %c0_57 = arith.constant 0 : index
    %c0_58 = arith.constant 0 : index
    %113 = vector.load %arg2[%c0_57, %c0_58] : memref<16x10xf32, #tpu.memory_space<vmem>>, vector<16x1xf32>
    %114 = vector.broadcast %113 : vector<16x1xf32> to vector<16x16xf32>
    %115 = arith.mulf %112, %114 : vector<16x16xf32>
    %c0_59 = arith.constant 0 : index
    %c16 = arith.constant 16 : index
    %116 = vector.load %arg5[%c0_59, %c16] : memref<16x320xf32, #tpu.memory_space<vmem>>, vector<16x16xf32>
    tpu.vector_store %arg5[%c0_59, %c16], %115 {strides = array<i32>} : memref<16x320xf32, #tpu.memory_space<vmem>>, vector<16x16xf32>,
    %c0_60 = arith.constant 0 : index
    %c1_61 = arith.constant 1 : index
    %117 = vector.load %arg2[%c0_60, %c1_61] : memref<16x10xf32, #tpu.memory_space<vmem>>, vector<16x1xf32>
    %118 = vector.broadcast %117 : vector<16x1xf32> to vector<16x16xf32>
    %119 = arith.mulf %112, %118 : vector<16x16xf32>
    %c0_62 = arith.constant 0 : index
    %c48 = arith.constant 48 : index
    %120 = vector.load %arg5[%c0_62, %c48] : memref<16x320xf32, #tpu.memory_space<vmem>>, vector<16x16xf32>
    tpu.vector_store %arg5[%c0_62, %c48], %119 {strides = array<i32>} : memref<16x320xf32, #tpu.memory_space<vmem>>, vector<16x16xf32>,
    %c0_63 = arith.constant 0 : index
    %c2_64 = arith.constant 2 : index
    %121 = vector.load %arg2[%c0_63, %c2_64] : memref<16x10xf32, #tpu.memory_space<vmem>>, vector<16x1xf32>
    %122 = vector.broadcast %121 : vector<16x1xf32> to vector<16x16xf32>
    %123 = arith.mulf %112, %122 : vector<16x16xf32>
    %c0_65 = arith.constant 0 : index
    %c80 = arith.constant 80 : index
    %124 = vector.load %arg5[%c0_65, %c80] : memref<16x320xf32, #tpu.memory_space<vmem>>, vector<16x16xf32>
    tpu.vector_store %arg5[%c0_65, %c80], %123 {strides = array<i32>} : memref<16x320xf32, #tpu.memory_space<vmem>>, vector<16x16xf32>,
    %c0_66 = arith.constant 0 : index
    %c3_67 = arith.constant 3 : index
    %125 = vector.load %arg2[%c0_66, %c3_67] : memref<16x10xf32, #tpu.memory_space<vmem>>, vector<16x1xf32>
    %126 = vector.broadcast %125 : vector<16x1xf32> to vector<16x16xf32>
    %127 = arith.mulf %112, %126 : vector<16x16xf32>
    %c0_68 = arith.constant 0 : index
    %c112 = arith.constant 112 : index
    %128 = vector.load %arg5[%c0_68, %c112] : memref<16x320xf32, #tpu.memory_space<vmem>>, vector<16x16xf32>
    tpu.vector_store %arg5[%c0_68, %c112], %127 {strides = array<i32>} : memref<16x320xf32, #tpu.memory_space<vmem>>, vector<16x16xf32>,
    %c0_69 = arith.constant 0 : index
    %c4_70 = arith.constant 4 : index
    %129 = vector.load %arg2[%c0_69, %c4_70] : memref<16x10xf32, #tpu.memory_space<vmem>>, vector<16x1xf32>
    %130 = vector.broadcast %129 : vector<16x1xf32> to vector<16x16xf32>
    %131 = arith.mulf %112, %130 : vector<16x16xf32>
    %c0_71 = arith.constant 0 : index
    %c144 = arith.constant 144 : index
    %132 = vector.load %arg5[%c0_71, %c144] : memref<16x320xf32, #tpu.memory_space<vmem>>, vector<16x16xf32>
    tpu.vector_store %arg5[%c0_71, %c144], %131 {strides = array<i32>} : memref<16x320xf32, #tpu.memory_space<vmem>>, vector<16x16xf32>,
    %c0_72 = arith.constant 0 : index
    %c5_73 = arith.constant 5 : index
    %133 = vector.load %arg2[%c0_72, %c5_73] : memref<16x10xf32, #tpu.memory_space<vmem>>, vector<16x1xf32>
    %134 = vector.broadcast %133 : vector<16x1xf32> to vector<16x16xf32>
    %135 = arith.mulf %112, %134 : vector<16x16xf32>
    %c0_74 = arith.constant 0 : index
    %c176 = arith.constant 176 : index
    %136 = vector.load %arg5[%c0_74, %c176] : memref<16x320xf32, #tpu.memory_space<vmem>>, vector<16x16xf32>
    tpu.vector_store %arg5[%c0_74, %c176], %135 {strides = array<i32>} : memref<16x320xf32, #tpu.memory_space<vmem>>, vector<16x16xf32>,
    %c0_75 = arith.constant 0 : index
    %c6_76 = arith.constant 6 : index
    %137 = vector.load %arg2[%c0_75, %c6_76] : memref<16x10xf32, #tpu.memory_space<vmem>>, vector<16x1xf32>
    %138 = vector.broadcast %137 : vector<16x1xf32> to vector<16x16xf32>
    %139 = arith.mulf %112, %138 : vector<16x16xf32>
    %c0_77 = arith.constant 0 : index
    %c208 = arith.constant 208 : index
    %140 = vector.load %arg5[%c0_77, %c208] : memref<16x320xf32, #tpu.memory_space<vmem>>, vector<16x16xf32>
    tpu.vector_store %arg5[%c0_77, %c208], %139 {strides = array<i32>} : memref<16x320xf32, #tpu.memory_space<vmem>>, vector<16x16xf32>,
    %c0_78 = arith.constant 0 : index
    %c7_79 = arith.constant 7 : index
    %141 = vector.load %arg2[%c0_78, %c7_79] : memref<16x10xf32, #tpu.memory_space<vmem>>, vector<16x1xf32>
    %142 = vector.broadcast %141 : vector<16x1xf32> to vector<16x16xf32>
    %143 = arith.mulf %112, %142 : vector<16x16xf32>
    %c0_80 = arith.constant 0 : index
    %c240 = arith.constant 240 : index
    %144 = vector.load %arg5[%c0_80, %c240] : memref<16x320xf32, #tpu.memory_space<vmem>>, vector<16x16xf32>
    tpu.vector_store %arg5[%c0_80, %c240], %143 {strides = array<i32>} : memref<16x320xf32, #tpu.memory_space<vmem>>, vector<16x16xf32>,
    %c0_81 = arith.constant 0 : index
    %c8_82 = arith.constant 8 : index
    %145 = vector.load %arg2[%c0_81, %c8_82] : memref<16x10xf32, #tpu.memory_space<vmem>>, vector<16x1xf32>
    %146 = vector.broadcast %145 : vector<16x1xf32> to vector<16x16xf32>
    %147 = arith.mulf %112, %146 : vector<16x16xf32>
    %c0_83 = arith.constant 0 : index
    %c272 = arith.constant 272 : index
    %148 = vector.load %arg5[%c0_83, %c272] : memref<16x320xf32, #tpu.memory_space<vmem>>, vector<16x16xf32>
    tpu.vector_store %arg5[%c0_83, %c272], %147 {strides = array<i32>} : memref<16x320xf32, #tpu.memory_space<vmem>>, vector<16x16xf32>,
    %c0_84 = arith.constant 0 : index
    %c9_85 = arith.constant 9 : index
    %149 = vector.load %arg2[%c0_84, %c9_85] : memref<16x10xf32, #tpu.memory_space<vmem>>, vector<16x1xf32>
    %150 = vector.broadcast %149 : vector<16x1xf32> to vector<16x16xf32>
    %151 = arith.mulf %112, %150 : vector<16x16xf32>
    %c0_86 = arith.constant 0 : index
    %c304 = arith.constant 304 : index
    %152 = vector.load %arg5[%c0_86, %c304] : memref<16x320xf32, #tpu.memory_space<vmem>>, vector<16x16xf32>
    tpu.vector_store %arg5[%c0_86, %c304], %151 {strides = array<i32>} : memref<16x320xf32, #tpu.memory_space<vmem>>, vector<16x16xf32>,
    return
  }
  func.func @transform_0(%arg0: i32) -> (i32, i32) {
    %c0_i32 = arith.constant 0 : i32
    %c0_i32_0 = arith.constant 0 : i32
    return %arg0, %c0_i32 : i32, i32
  }
  func.func @transform_1(%arg0: i32) -> (i32, i32) {
    %c0_i32 = arith.constant 0 : i32
    %c0_i32_0 = arith.constant 0 : i32
    return %arg0, %c0_i32 : i32, i32
  }
  func.func @transform_2(%arg0: i32) -> (i32, i32) {
    %c0_i32 = arith.constant 0 : i32
    %c0_i32_0 = arith.constant 0 : i32
    %c0_i32_1 = arith.constant 0 : i32
    return %c0_i32, %c0_i32_0 : i32, i32
  }
  func.func @transform_3(%arg0: i32) -> (i32, i32) {
    %c0_i32 = arith.constant 0 : i32
    %c0_i32_0 = arith.constant 0 : i32
    %c0_i32_1 = arith.constant 0 : i32
    return %c0_i32, %c0_i32_0 : i32, i32
  }
  func.func @transform_4(%arg0: i32) -> (i32, i32) {
    %c0_i32 = arith.constant 0 : i32
    %c0_i32_0 = arith.constant 0 : i32
    return %arg0, %c0_i32 : i32, i32
  }
}

</mosaic_0001>

<bundles_post_ra>
// kernel: vfe_forward.2
= control target key start
LH: loop header
LB: loop body
LE: loop exit
PB: predicated region body
PF: predicated region fallthrough
CT: control target
= control target key end

     0   :  { %s733_s9 = smov 0   ;;  %s735_s10 = smov 0   ;;  %s862_s0 = inlined_call_operand.vmem [shape: f32[50,70], index: 0, kind: input, shape index: {}]   ;;  %s863_s1 = inlined_call_operand.vmem [shape: f32[2,1,70], index: 1, kind: output, shape index: {0}]   ;;  %s864_s2 = inlined_call_operand.vmem [shape: f32[2,70,70], index: 2, kind: output, shape index: {1}]  }
   0x1   :  { %s737_s11 = smov 0   ;;  %s739_s12 = smov 0  }
   0x2   :  { %s741_s13 = smov 0  }
   0x3 LB: > { %s22_s14 = sadd.s32 1, %s704_s11  ;;  %s25_s15 = sadd.s32 1, %s708_s12  ;;  %s712_s13 = sphi %s741_s13, %s13_s13   ;;  %s708_s12 = sphi %s739_s12, %s868_s12   ;;  %s704_s11 = sphi %s737_s11, %s867_s11   ;;  %s700_s10 = sphi %s735_s10, %s866_s10   ;;  %s696_s9 = sphi %s733_s9, %s865_s9  }
   0x4   : > { %p23_p0 = scmp.ge.s32.totalorder %s22_s14, 2  ;;  %p560_p1 = scmp.ge.s32.totalorder %s712_s13, 1 }
   0x5   : > { %p152_p2 = scmp.lt.s32.totalorder %s712_s13, 5 }
   0x6   : > { %s870_s14 = smov (%p23_p0, %s22_s14), 0  ;;  %s872_s15 = smov (!%p23_p0, %s25_s15), %s708_s12 }
   0x7   : > { %p153_p3 = pnand %p560_p1, %p152_p2  ;;  %p27_p4 = scmp.ge.s32.totalorder %s872_s15, 2 }
   0x8   : > { %s561_s16 = sshll.u32 (!%p153_p3), %s700_s10, 1  ;;  %p207_p5 = scmp.lt.s32.totalorder (!%p153_p3), %s700_s10, 1 }
   0x9   : > { %s874_s15 = smov (%p27_p4, %s872_s15), 0  ;;  %156 = sbr.rel (%p153_p3) target bundleno = 410 (0x19a), region = 24 }
   0xa   : > { %s766_s17 = sadd.s32 (!%p153_p3), %s696_s9, %s561_s16  ;;  %p565_p8 = scmp.ne.s32.totalorder (!%p153_p3), %s696_s9, 0 }
   0xb   : > { %p187_p6 = scmp.lt.s32.totalorder (!%p153_p3), %s766_s17, 3 }
  0x10   : > { %s876_s10 = smov (!%p207_p5, %s700_s10), 1  ;;  %vm219_vm0 = vcmask (!%p565_p8), 565248   ;;  %vm221_vm1 = vcmask (!%p565_p8), 572416   ;;  %vm230_vm2 = vcmask (!%p565_p8), 570368   ;;  %v714_v0 = vmov (!%p565_p8), 0.0  }
  0x11   : > { %s188_s18 = scalar_select %p187_p6, %s766_s17, 3 }
  0x12   : > { %s773_s21 = scalar_lea.vmem %s863_s1, %s876_s10  ;;  %s629_s22 = smul.u32 72, %s876_s10 }
  0x13   : > { %s562_s23 = sshll.u32 %s188_s18, 1  ;;  %218 = sbr.rel (%p565_p8) target bundleno = 26 (0x1a), region = 28  ;;  %220 = vst.msk [vmem:[%s773_s21] sm:$0x1] (!%p565_p8), %vm219_vm0, %v714_v0 }
  0x14   : > { %p194_p7 = scmp.lt.s32.totalorder %s562_s23, 6  ;;  %s778_s26 = scalar_lea.vmem %s864_s2, %s629_s22 }
  0x15   : > { %222 = vst.msk [vmem:[%s778_s26] sm:$0xff] (!%p565_p8), %vm221_vm1, %v714_v0  ;;  %223 = vst.msk [vmem:[%s778_s26 + $0x8] sm:$0xff] (!%p565_p8), %vm221_vm1, %v714_v0 }
  0x16   : > { %s878_s23 = smov (!%p194_p7, %s562_s23), 6  ;;  %224 = vst.msk [vmem:[%s778_s26 + $0x10] sm:$0xff] (!%p565_p8), %vm221_vm1, %v714_v0  ;;  %225 = vst.msk [vmem:[%s778_s26 + $0x18] sm:$0xff] (!%p565_p8), %vm221_vm1, %v714_v0 }
  0x17   : > { %s563_s27 = sshll.u32 %s878_s23, 3  ;;  %226 = vst.msk [vmem:[%s778_s26 + $0x20] sm:$0xff] (!%p565_p8), %vm221_vm1, %v714_v0  ;;  %227 = vst.msk [vmem:[%s778_s26 + $0x28] sm:$0xff] (!%p565_p8), %vm221_vm1, %v714_v0 }
  0x18   : > { %s783_s30 = scalar_lea.vmem %s862_s0, %s563_s27  ;;  %228 = vst.msk [vmem:[%s778_s26 + $0x30] sm:$0xff] (!%p565_p8), %vm221_vm1, %v714_v0  ;;  %229 = vst.msk [vmem:[%s778_s26 + $0x38] sm:$0xff] (!%p565_p8), %vm221_vm1, %v714_v0 }
  0x19   : > { %231 = vst.msk [vmem:[%s778_s26 + $0x40] sm:$0x3f] (!%p565_p8), %vm230_vm2, %v714_v0 }
  0x1a PF: > { %s567_s3 = sshll.u32 %s766_s17, 4  ;;  %v235_v1 = vlaneseq  ;;  %v715_v4 = vmov 0.0|0.0   ;;  %vm716_vm3 = vmmov 0   ;;  %v717_v5 = vmov 0.0   ;;  %v243_v7 = vld [vmem:[%s783_s30] sm:$0xff]  ;;  %v244_v9 = vld [vmem:[%s783_s30 + $0x8] sm:$0xff] }
  0x1b   : > { %v238_v2 = vstv %s567_s3  ;;  %623 = vmatprep.subr.bf16.mxu0 %v715_v4  ;;  %627 = vmatprep.subr.bf16.mxu1 %v715_v4  ;;  %v624_v11 = vpack.c.bf16 %v244_v9, %v243_v7  ;;  %vm252_vm5 = vcmask 572416   ;;  %v251_v22 = vld [vmem:[%s773_s21] sm:$0x1]  ;;  %vm263_vm8 = vcmask 565248  }
  0x1c   : > { %v236_v3 = vshrl.u32 %v235_v1, 7  ;;  %596 = vmatprep.mubr.msk.f32.mxu0 %vm716_vm3, %v717_v5  ;;  %611 = vmatprep.mubr.msk.f32.mxu1 %vm716_vm3, %v717_v5  ;;  %vm306_vm9 = vcmask 130048   ;;  %v265_v34 = vld [vmem:[%s778_s26] sm:$0xff]  ;;  %v266_v38 = vld [vmem:[%s778_s26 + $0x8] sm:$0xff]  ;;  %vm461_vm10 = vcmask 570368  }
  0x1d   : > { %v267_v42 = vld [vmem:[%s778_s26 + $0x10] sm:$0xff]  ;;  %v268_v46 = vld [vmem:[%s778_s26 + $0x18] sm:$0xff] }
  0x1e   : > { %v239_v6 = vadd.s32 %v238_v2, %v236_v3  ;;  %v237_v8 = vadd.s32 8, %v236_v3  ;;  %v269_v50 = vld [vmem:[%s778_s26 + $0x20] sm:$0xff]  ;;  %v270_v54 = vld [vmem:[%s778_s26 + $0x28] sm:$0xff] }
  0x1f   : > { %v271_v58 = vld [vmem:[%s778_s26 + $0x30] sm:$0xff]  ;;  %v272_v62 = vld [vmem:[%s778_s26 + $0x38] sm:$0xff] }
  0x20   : > { %vm241_vm4 = vcmp.lt.s32.totalorder %v239_v6, 50  ;;  %v240_v10 = vadd.s32 %v238_v2, %v237_v8  ;;  %v273_v2 = vld [vmem:[%s778_s26 + $0x40] sm:$0x3f] }
  0x21   : > { %v249_v12 = vsel %vm241_vm4, %v243_v7, 0.0 }
  0x22   : > { %274 = vxpose.xlu0.b32.start [1/2] (short) (narrow) %v249_v12, 72  ;;  %v253_v13 = vsel %vm252_vm5, %v249_v12, 0.0  ;;  %vm242_vm6 = vcmp.lt.s32.totalorder %v240_v10, 50 }
  0x23   : > { %v250_v14 = vsel %vm242_vm6, %v244_v9, 0.0  ;;  %vm625_vm7 = vmpackc.low %vm242_vm6, %vm241_vm4 }
  0x24   : > { %v254_v15 = vsel %vm252_vm5, %v250_v14, 0.0  ;;  %626 = vmatpush3.bf16.msk.msra.mxu0 %vm625_vm7, %v624_v11  ;;  %628 = vmatpush3.bf16.msk.msra.mxu1 %vm625_vm7, %v624_v11 }
  0x25   : > { %v255_v16 = vadd.f32 %v254_v15, %v253_v13 }
  0x26   : > { %275 = vxpose.xlu0.b32.end [2/2] (short) (narrow) %v250_v14, 72 }
  0x27   : > { %v256_v17 = vrot.slane %v255_v16, 4 }
  0x29   : > { %v257_v18 = vadd.f32 %v256_v17, %v255_v16 }
  0x2b   : > { %v258_v19 = vrot.slane %v257_v18, 2 }
  0x2d   : > { %v259_v20 = vadd.f32 %v258_v19, %v257_v18 }
  0x2f   : > { %v260_v21 = vrot.slane %v259_v20, 1 }
  0x31   : > { %v261_v23 = vadd.f32 %v260_v21, %v259_v20 }
  0x33   : > { %v262_v24 = vadd.f32 %v261_v23, %v251_v22 }
  0x35   : > { %264 = vst.msk [vmem:[%s773_s21] sm:$0x1] %vm263_vm8, %v262_v24 }
  0xa2   : > { %v290_v25 = vpop.trf.xlu0 }
  0xa3   : > { %597 = vmatmul.mubr.msk.f32.vlgmr.msra.gmra.mrb[0].mxu0 %vm306_vm9, %v290_v25 }
  0xa4   : > { %599 = vmatprep.mubr.msk.f32.mxu0 %vm716_vm3, %v717_v5 }
  0xa6   : > { %v291_v26 = vpop.trf.xlu0 }
  0xa7   : > { %600 = vmatmul.mubr.msk.f32.gmra.mrb[2].mxu0 %vm306_vm9, %v291_v26 }
  0xa8   : > { %602 = vmatprep.mubr.msk.f32.mxu0 %vm716_vm3, %v717_v5 }
  0xaa   : > { %v292_v27 = vpop.trf.xlu0 }
  0xab   : > { %603 = vmatmul.mubr.msk.f32.gmra.mrb[4].mxu0 %vm306_vm9, %v292_v27 }
  0xac   : > { %605 = vmatprep.mubr.msk.f32.mxu0 %vm716_vm3, %v717_v5 }
  0xae   : > { %v293_v28 = vpop.trf.xlu0 }
  0xaf   : > { %606 = vmatmul.mubr.msk.f32.gmra.mrb[6].mxu0 %vm306_vm9, %v293_v28 }
  0xb0   : > { %608 = vmatprep.mubr.msk.f32.mxu0 %vm716_vm3, %v717_v5 }
  0xb2   : > { %v294_v29 = vpop.trf.xlu0 }
  0xb3   : > { %609 = vmatmul.mubr.msk.f32.gmra.mrb[8].mxu0 %vm306_vm9, %v294_v29 }
  0xb6   : > { %v295_v30 = vpop.trf.xlu0 }
  0xb7   : > { %612 = vmatmul.mubr.msk.f32.vlgmr.msra.gmra.mrb[0].mxu1 %vm306_vm9, %v295_v30 }
  0xb8   : > { %614 = vmatprep.mubr.msk.f32.mxu1 %vm716_vm3, %v717_v5 }
  0xba   : > { %v296_v31 = vpop.trf.xlu0 }
  0xbb   : > { %615 = vmatmul.mubr.msk.f32.gmra.mrb[2].mxu1 %vm306_vm9, %v296_v31 }
  0xbc   : > { %617 = vmatprep.mubr.msk.f32.mxu1 %vm716_vm3, %v717_v5 }
  0xbe   : > { %v297_v32 = vpop.trf.xlu0 }
  0xbf   : > { %618 = vmatmul.mubr.msk.f32.gmra.mrb[4].mxu1 %vm306_vm9, %v297_v32 }
  0xc0   : > { %620 = vmatprep.mubr.msk.f32.mxu1 %vm716_vm3, %v717_v5 }
  0xc2   : > { %v298_v33 = vpop.trf.xlu0 }
  0xc3   : > { %621 = vmatmul.mubr.msk.f32.gmra.mrb[6].mxu1 %vm306_vm9, %v298_v33 }
 0x176   : > { %v400_v35 = vpop.f32.mrb[0].mxu0 }
 0x177   : > { %v444_v36 = vadd.f32 %v400_v35, %v265_v34  ;;  %v598_v37 = vpop.f32.mrb[1].mxu0 }
 0x179   : > { %453 = vst.msk [vmem:[%s778_s26] sm:$0xff] %vm252_vm5, %v444_v36 }
 0x17a   : > { %v405_v39 = vpop.f32.mrb[2].mxu0 }
 0x17b   : > { %v445_v40 = vadd.f32 %v405_v39, %v266_v38  ;;  %v601_v41 = vpop.f32.mrb[3].mxu0 }
 0x17d   : > { %454 = vst.msk [vmem:[%s778_s26 + $0x8] sm:$0xff] %vm252_vm5, %v445_v40 }
 0x17e   : > { %v410_v43 = vpop.f32.mrb[4].mxu0 }
 0x17f   : > { %v446_v44 = vadd.f32 %v410_v43, %v267_v42  ;;  %v604_v45 = vpop.f32.mrb[5].mxu0 }
 0x181   : > { %455 = vst.msk [vmem:[%s778_s26 + $0x10] sm:$0xff] %vm252_vm5, %v446_v44 }
 0x182   : > { %v415_v47 = vpop.f32.mrb[6].mxu0 }
 0x183   : > { %v447_v48 = vadd.f32 %v415_v47, %v268_v46  ;;  %v607_v49 = vpop.f32.mrb[7].mxu0 }
 0x185   : > { %456 = vst.msk [vmem:[%s778_s26 + $0x18] sm:$0xff] %vm252_vm5, %v447_v48 }
 0x186   : > { %v420_v51 = vpop.f32.mrb[8].mxu0 }
 0x187   : > { %v448_v52 = vadd.f32 %v420_v51, %v269_v50  ;;  %v610_v53 = vpop.f32.mrb[9].mxu0 }
 0x189   : > { %457 = vst.msk [vmem:[%s778_s26 + $0x20] sm:$0xff] %vm252_vm5, %v448_v52 }
 0x18a   : > { %v425_v55 = vpop.f32.mrb[0].mxu1 }
 0x18b   : > { %v449_v56 = vadd.f32 %v425_v55, %v270_v54  ;;  %v613_v57 = vpop.f32.mrb[1].mxu1 }
 0x18d   : > { %458 = vst.msk [vmem:[%s778_s26 + $0x28] sm:$0xff] %vm252_vm5, %v449_v56 }
 0x18e   : > { %v430_v59 = vpop.f32.mrb[2].mxu1 }
 0x18f   : > { %v450_v60 = vadd.f32 %v430_v59, %v271_v58  ;;  %v616_v61 = vpop.f32.mrb[3].mxu1 }
 0x191   : > { %459 = vst.msk [vmem:[%s778_s26 + $0x30] sm:$0xff] %vm252_vm5, %v450_v60 }
 0x192   : > { %v435_v63 = vpop.f32.mrb[4].mxu1 }
 0x193   : > { %v451_v0 = vadd.f32 %v435_v63, %v272_v62  ;;  %v619_v1 = vpop.f32.mrb[5].mxu1 }
 0x195   : > { %460 = vst.msk [vmem:[%s778_s26 + $0x38] sm:$0xff] %vm252_vm5, %v451_v0 }
 0x196   : > { %v440_v3 = vpop.f32.mrb[6].mxu1 }
 0x197   : > { %v452_v4 = vadd.f32 %v440_v3, %v273_v2  ;;  %v622_v5 = vpop.f32.mrb[7].mxu1 }
 0x199   : > { %462 = vst.msk [vmem:[%s778_s26 + $0x40] sm:$0x3f] %vm461_vm10, %v452_v4 }
 0x19a PF: > { %s13_s13 = sadd.s32 1, %s712_s13   ;;  %s865_s9 = smov %s704_s11 }
 0x19b   : > { %p10_p9 = scmp.ge.s32.totalorder %s13_s13, 6   ;;  %s866_s10 = smov %s708_s12 }
 0x19c   : > { %s867_s11 = smov %s870_s14  ;;  %s868_s12 = smov %s874_s15 }
 0x19d   :  { %12 = sbr.rel (!%p10_p9) target bundleno = 3 (0x3), region = 70 }

// kernel: vfe_forward.3
= control target key start
LH: loop header
LB: loop body
LE: loop exit
PB: predicated region body
PF: predicated region fallthrough
CT: control target
= control target key end

     0   :  { %s2246_s15 = smov 0   ;;  %s2248_s16 = smov 0   ;;  %s2694_s0 = inlined_call_operand.vmem [shape: f32[50,70], index: 0, kind: input, shape index: {}]   ;;  %s2695_s1 = inlined_call_operand.vmem [shape: f32[50,10], index: 1, kind: input, shape index: {}]   ;;  %s2696_s2 = inlined_call_operand.vmem [shape: f32[7,16], index: 2, kind: input, shape index: {}]   ;;  %s2697_s3 = inlined_call_operand.vmem [shape: f32[1,16], index: 3, kind: input, shape index: {}]   ;;  %s2698_s4 = inlined_call_operand.vmem [shape: f32[50,320], index: 4, kind: output, shape index: {}]  }
   0x1   :  { %s2250_s17 = smov 0  }
   0x2 LB: > { %s2259_s18 = sadd.s32 4294967295, %s2161_s17   ;;  %s2261_s19 = sadd.s32 1, %s2161_s17   ;;  %s2161_s17 = sphi %s2250_s17, %s2706_s17   ;;  %s2157_s16 = sphi %s2248_s16, %s2705_s16   ;;  %s2153_s15 = sphi %s2246_s15, %s2704_s15  }
   0x3   : > { %s112_s20 = ssub.s32 %s2161_s17, %s2261_s19  ;;  %s115_s21 = sadd.s32 1, %s2157_s16 }
   0x4   : > { %p113_p0 = scmp.eq.s32.totalorder %s112_s20, 0  ;;  %p125_p1 = scmp.ne.s32.totalorder %s2157_s16, %s2153_s15 }
   0x5   : > { %p126_p2 = scmp.eq.s32.totalorder %s2259_s18, 3  ;;  %p1830_p3 = scmp.ge.s32.totalorder %s2161_s17, 1 }
   0x6   : > { %s2269_s22 = scalar_select %p113_p0, %s2157_s16, %s115_s21  }
   0x7   : > { %p2271_p4 = por %p126_p2, %p125_p1  ;;  %p190_p5 = scmp.lt.s32.totalorder %s2161_s17, 5 }
   0x9   : > { %p191_p6 = pnand %p1830_p3, %p190_p5 }
   0xa   : > { %s2276_s24 = sshll.u32 (!%p191_p6), %s2259_s18, 1  ;;  %v2281_v0 = vld [vmem:[%s2696_s2] sm:$0x7f] (!%p191_p6)  ;;  %vm279_vm0 = vcmask (!%p191_p6), 1046528   ;;  %v2195_v1 = vmov (!%p191_p6), 0   ;;  %vm272_vm1 = vcmask (!%p191_p6), 56320  }
   0xb   : > { %194 = sbr.rel (%p191_p6) target bundleno = 605 (0x25d), region = 36  ;;  %p233_p7 = scmp.lt.s32.totalorder (!%p191_p6), %s2276_s24, 6  ;;  %1910 = vmatprep.subr.msk.mxu0 (!%p191_p6), %vm279_vm0, %v2281_v0  ;;  %1915 = vmatprep.subr.msk.mxu1 (!%p191_p6), %vm279_vm0, %v2281_v0  ;;  %v2202_v4 = vmov (!%p191_p6), 5   ;;  %v2206_v7 = vmov (!%p191_p6), 1   ;;  %v2207_v8 = vmov (!%p191_p6), 8   ;;  %v2208_v9 = vmov (!%p191_p6), 2  }
   0xc   : > { %1911 = vmatpush3.msk.msra.mxu0 (!%p191_p6), %vm279_vm0, %v2281_v0  ;;  %1916 = vmatpush3.msk.msra.mxu1 (!%p191_p6), %vm279_vm0, %v2281_v0  ;;  %s2196_s6 = smov (!%p191_p6), 114   ;;  %s2197_s7 = smov (!%p191_p6), 121   ;;  %v2209_v10 = vmov (!%p191_p6), 3   ;;  %v2210_v11 = vmov (!%p191_p6), 4   ;;  %v2211_v12 = vmov (!%p191_p6), 6   ;;  %v2212_v13 = vmov (!%p191_p6), 7  }
   0xd   : > { %1920 = vmatprep.subr.msk.mxu0 (!%p191_p6), %vm279_vm0, %v2281_v0  ;;  %1925 = vmatprep.subr.msk.mxu1 (!%p191_p6), %vm279_vm0, %v2281_v0  ;;  %s2198_s8 = smov (!%p191_p6), 107   ;;  %s2199_s9 = smov (!%p191_p6), 100   ;;  %v2213_v14 = vmov (!%p191_p6), 9   ;;  %v2427_v34 = vld [vmem:[%s2697_s3] ss:$0 sm:$0xff] (!%p191_p6)  ;;  %vm374_vm2 = vcmask (!%p191_p6), 130048  }
   0xe   : > { %2076 = vset.pattern.permute.xlu1 (!%p191_p6), %v2195_v1  ;;  %s2200_s10 = smov (!%p191_p6), 93   ;;  %s2201_s11 = smov (!%p191_p6), 86   ;;  %2082 = vset.pattern.permute.xlu0 (!%p191_p6), %v2202_v4  ;;  %vm490_vm3 = vcmask (!%p191_p6), 392448   ;;  %vm606_vm4 = vcmask (!%p191_p6), 654848   ;;  %vm722_vm5 = vcmask (!%p191_p6), 917248   ;;  %vm1423_vm6 = vcmask (!%p191_p6), 261248  }
   0xf   : > { %s2203_s12 = smov (!%p191_p6), 79   ;;  %s2204_s13 = smov (!%p191_p6), 72   ;;  %vm1448_vm7 = vcmask (!%p191_p6), 523648   ;;  %vm1473_vm8 = vcmask (!%p191_p6), 786048   ;;  %vm1498_vm9 = vcmask (!%p191_p6), 1048448  }
  0x10   : > { %s2205_s21 = smov (!%p191_p6), 65   ;;  %s225_s25 = sand.u32 (!%p191_p6), 1, %s2153_s15  }
  0x11   : > { %s2214_s29 = smov (!%p191_p6), 32   ;;  %s2215_s30 = smov (!%p191_p6), 64  }
  0x12   : > { %s2293_s27 = scalar_select %p233_p7, %s2276_s24, 6 }
  0x14   : > { %s1832_s28 = sshll.u32 %s2293_s27, 3 }
  0x15   : > { %s236_s5 = scalar_lea.vmem %s2694_s0, %s1832_s28  ;;  %s250_s20 = scalar_lea.vmem %s2695_s1, %s1832_s28 }
  0x16   : > { %v495_v2 = vld [vmem:[%s236_s5] sm:$0xff]  ;;  %v496_v3 = vld [vmem:[%s236_s5 + $0x8] sm:$0xff]  ;;  %s1960_s28 = smul.u32 48, %s225_s25  ;;  %s2216_s5 = smov 96  }
  0x17   : > { %499 = vrot.lane.b32.xlu1 %v495_v2, %s2196_s6  ;;  %383 = vrot.lane.b32.xlu0 %v495_v2, %s2197_s7  ;;  %v2318_v5 = vld [vmem:[%s250_s20 + $0x8] sm:$0xff]  ;;  %v2322_v6 = vld [vmem:[%s250_s20] sm:$0xff] }
  0x18   : > { %1912 = vmatprep.mubr.msk.f32.mxu0 %vm272_vm1, %v495_v2  ;;  %s2433_s15 = scalar_lea.vmem [#allocation2], %s1960_s28  }
  0x19   : > { %1913 = vmatmul.mubr.msk.f32.vlgmr.msra.gmra.mrb[0].mxu0 %vm272_vm1, %v496_v3 }
  0x1a   : > { %1921 = vmatpush3.msk.msra.mxu0 %vm279_vm0, %v2281_v0 }
  0x1b   : > { %501 = vrot.lane.b32.xlu1 %v496_v3, %s2196_s6  ;;  %385 = vrot.lane.b32.xlu0 %v496_v3, %s2197_s7  ;;  %s2217_s6 = smov 16   ;;  %s2218_s7 = smov 48  }
  0x1c   : > { %1930 = vmatprep.subr.msk.mxu0 %vm279_vm0, %v2281_v0 }
  0x1f   : > { %615 = vrot.lane.b32.xlu0 %v495_v2, %s2198_s8  ;;  %617 = vrot.lane.b32.xlu1 %v496_v3, %s2198_s8  ;;  %s2219_s8 = smov 80  }
  0x23   : > { %731 = vrot.lane.b32.xlu0 %v495_v2, %s2199_s9  ;;  %733 = vrot.lane.b32.xlu1 %v496_v3, %s2199_s9  ;;  %s2220_s9 = smov 112  }
  0x27   : > { %838 = vrot.lane.b32.xlu0 %v495_v2, %s2200_s10  ;;  %840 = vrot.lane.b32.xlu1 %v496_v3, %s2200_s10  ;;  %s1653_s10 = ssub.s32 (%p2271_p4), 7, %s2276_s24 }
  0x28   : > { %p1654_p8 = scmp.lt.s32.totalorder (%p2271_p4), %s1653_s10, 2 }
  0x2b   : > { %953 = vrot.lane.b32.xlu0 %v495_v2, %s2201_s11  ;;  %955 = vrot.lane.b32.xlu1 %v496_v3, %s2201_s11  ;;  %s1961_s11 = smul.u32 (%p2271_p4), 48, %s2259_s18 }
  0x2d   : > { %s2627_s14 = scalar_lea.vmem (%p2271_p4), %s2698_s4, %s1961_s11  }
  0x2f   : > { %1068 = vrot.lane.b32.xlu0 %v495_v2, %s2203_s12  ;;  %1070 = vrot.lane.b32.xlu1 %v496_v3, %s2203_s12 }
  0x33   : > { %1183 = vrot.lane.b32.xlu0 %v495_v2, %s2204_s13  ;;  %1185 = vrot.lane.b32.xlu1 %v496_v3, %s2204_s13 }
  0x37   : > { %1290 = vrot.lane.b32.xlu0 %v495_v2, %s2205_s21  ;;  %1292 = vrot.lane.b32.xlu1 %v496_v3, %s2205_s21 }
  0x3b   : > { %369 = vperm.xlu1 %2076, %v2318_v5   ;;  %932 = vperm.xlu0 %2082, %v2318_v5  }
  0x3f   : > { %2077 = vset.pattern.permute.xlu1 %v2206_v7  ;;  %2085 = vset.pattern.permute.xlu0 %v2207_v8 }
  0x40   : > { %472 = vperm.xlu1 %2077, %v2322_v6   ;;  %1272 = vperm.xlu0 %2085, %v2322_v6  }
  0x44   : > { %2078 = vset.pattern.permute.xlu1 %v2208_v9  ;;  %2086 = vset.pattern.permute.xlu0 %v2195_v1 }
  0x45   : > { %593 = vperm.xlu1 %2078, %v2318_v5   ;;  %364 = vperm.xlu0 %2086, %v2322_v6  }
  0x49   : > { %2079 = vset.pattern.permute.xlu1 %v2209_v10  ;;  %1405 = vperm.xlu0 %2086, %v2322_v6  }
  0x4a   : > { %704 = vperm.xlu1 %2079, %v2322_v6  }
  0x4d   : > { %2089 = vset.pattern.permute.xlu0 %v2210_v11 }
  0x4e   : > { %2080 = vset.pattern.permute.xlu1 %v2210_v11  ;;  %820 = vperm.xlu0 %2089, %v2322_v6  }
  0x4f   : > { %825 = vperm.xlu1 %2080, %v2318_v5  }
  0x52   : > { %1510 = vperm.xlu0 %2089, %v2318_v5  }
  0x53   : > { %2081 = vset.pattern.permute.xlu1 %v2202_v4 }
  0x54   : > { %927 = vperm.xlu1 %2081, %v2322_v6  }
  0x56   : > { %2092 = vset.pattern.permute.xlu0 %v2206_v7 }
  0x57   : > { %477 = vperm.xlu0 %2092, %v2318_v5  }
  0x58   : > { %2083 = vset.pattern.permute.xlu1 %v2211_v12 }
  0x59   : > { %1047 = vperm.xlu1 %2083, %v2318_v5  }
  0x5b   : > { %1435 = vperm.xlu0 %2092, %v2318_v5  }
  0x5d   : > { %2084 = vset.pattern.permute.xlu1 %v2212_v13 }
  0x5e   : > { %1157 = vperm.xlu1 %2084, %v2322_v6  }
  0x5f   : > { %2095 = vset.pattern.permute.xlu0 %v2208_v9 }
  0x60   : > { %588 = vperm.xlu0 %2095, %v2322_v6  }
  0x62   : > { %2087 = vset.pattern.permute.xlu1 %v2207_v8 }
  0x63   : > { %1277 = vperm.xlu1 %2087, %v2318_v5  }
  0x64   : > { %1455 = vperm.xlu0 %2095, %v2322_v6  }
  0x67   : > { %2088 = vset.pattern.permute.xlu1 %v2213_v14 }
  0x68   : > { %1379 = vperm.xlu1 %2088, %v2322_v6   ;;  %2097 = vset.pattern.permute.xlu0 %v2211_v12 }
  0x69   : > { %1042 = vperm.xlu0 %2097, %v2322_v6  }
  0x6c   : > { %2090 = vset.pattern.permute.xlu1 %v2195_v1 }
  0x6d   : > { %1410 = vperm.xlu1 %2090, %v2318_v5   ;;  %1558 = vperm.xlu0 %2097, %v2318_v5  }
  0x71   : > { %2091 = vset.pattern.permute.xlu1 %v2210_v11  ;;  %2100 = vset.pattern.permute.xlu0 %v2209_v10 }
  0x72   : > { %1505 = vperm.xlu1 %2091, %v2322_v6   ;;  %709 = vperm.xlu0 %2100, %v2318_v5  }
  0x76   : > { %2093 = vset.pattern.permute.xlu1 %v2213_v14  ;;  %1480 = vperm.xlu0 %2100, %v2322_v6  }
  0x77   : > { %1384 = vperm.xlu1 %2093, %v2318_v5  }
  0x7a   : > { %2102 = vset.pattern.permute.xlu0 %v2212_v13 }
  0x7b   : > { %2094 = vset.pattern.permute.xlu1 %v2206_v7  ;;  %1162 = vperm.xlu0 %2102, %v2318_v5  }
  0x7c   : > { %1430 = vperm.xlu1 %2094, %v2322_v6  }
  0x7f   : > { %1582 = vperm.xlu0 %2102, %v2318_v5  }
  0x80   : > { %2096 = vset.pattern.permute.xlu1 %v2202_v4 }
  0x81   : > { %1529 = vperm.xlu1 %2096, %v2322_v6  }
  0x83   : > { %2106 = vset.pattern.permute.xlu0 %v2213_v14 }
  0x85   : > { %1534 = vperm.xlu1 %2096, %v2318_v5  }
  0x89   : > { %v500_v15 = vpop.permute.xlu1 %499  ;;  %v384_v16 = vpop.permute.xlu0 %383  ;;  %2098 = vset.pattern.permute.xlu1 %v2208_v9 }
  0x8a   : > { %1917 = vmatprep.mubr.msk.f32.mxu1 %vm272_vm1, %v384_v16  ;;  %1922 = vmatprep.mubr.msk.f32.mxu0 %vm272_vm1, %v500_v15 }
  0x8b   : > { %1460 = vperm.xlu1 %2098, %v2318_v5  }
  0x8d   : > { %v502_v17 = vpop.permute.xlu1 %501  ;;  %v386_v18 = vpop.permute.xlu0 %385 }
  0x8e   : > { %1918 = vmatmul.mubr.msk.f32.vlgmr.msra.gmra.mrb[0].mxu1 %vm272_vm1, %v386_v18  ;;  %1923 = vmatmul.mubr.msk.f32.vlgmr.msra.gmra.mrb[2].mxu0 %vm272_vm1, %v502_v17 }
  0x8f   : > { %1926 = vmatpush3.msk.msra.mxu1 %vm279_vm0, %v2281_v0  ;;  %1931 = vmatpush3.msk.msra.mxu0 %vm279_vm0, %v2281_v0 }
  0x90   : > { %1935 = vmatprep.subr.msk.mxu1 %vm279_vm0, %v2281_v0  ;;  %1940 = vmatprep.subr.msk.mxu0 %vm279_vm0, %v2281_v0 }
  0x91   : > { %v616_v19 = vpop.permute.xlu0 %615  ;;  %v618_v20 = vpop.permute.xlu1 %617  ;;  %2099 = vset.pattern.permute.xlu1 %v2211_v12 }
  0x92   : > { %1927 = vmatprep.mubr.msk.f32.mxu1 %vm272_vm1, %v616_v19  ;;  %1553 = vperm.xlu1 %2099, %v2322_v6  }
  0x93   : > { %1928 = vmatmul.mubr.msk.f32.vlgmr.msra.gmra.mrb[2].mxu1 %vm272_vm1, %v618_v20 }
  0x94   : > { %1936 = vmatpush3.msk.msra.mxu1 %vm279_vm0, %v2281_v0 }
  0x95   : > { %v732_v21 = vpop.permute.xlu0 %731  ;;  %v734_v22 = vpop.permute.xlu1 %733  ;;  %1945 = vmatprep.subr.msk.mxu1 %vm279_vm0, %v2281_v0 }
  0x96   : > { %1932 = vmatprep.mubr.msk.f32.mxu0 %vm272_vm1, %v732_v21  ;;  %2101 = vset.pattern.permute.xlu1 %v2207_v8 }
  0x97   : > { %1933 = vmatmul.mubr.msk.f32.vlgmr.msra.gmra.mrb[4].mxu0 %vm272_vm1, %v734_v22  ;;  %1601 = vperm.xlu1 %2101, %v2322_v6  }
  0x98   : > { %1941 = vmatpush3.msk.msra.mxu0 %vm279_vm0, %v2281_v0 }
  0x99   : > { %v839_v23 = vpop.permute.xlu0 %838  ;;  %v841_v24 = vpop.permute.xlu1 %840  ;;  %1950 = vmatprep.subr.msk.mxu0 %vm279_vm0, %v2281_v0 }
  0x9a   : > { %1937 = vmatprep.mubr.msk.f32.mxu1 %vm272_vm1, %v839_v23 }
  0x9b   : > { %1938 = vmatmul.mubr.msk.f32.vlgmr.msra.gmra.mrb[4].mxu1 %vm272_vm1, %v841_v24  ;;  %1606 = vperm.xlu1 %2101, %v2318_v5  }
  0x9c   : > { %1946 = vmatpush3.msk.msra.mxu1 %vm279_vm0, %v2281_v0 }
  0x9d   : > { %v954_v25 = vpop.permute.xlu0 %953  ;;  %v956_v26 = vpop.permute.xlu1 %955  ;;  %1955 = vmatprep.subr.msk.mxu1 %vm279_vm0, %v2281_v0 }
  0x9e   : > { %1942 = vmatprep.mubr.msk.f32.mxu0 %vm272_vm1, %v954_v25 }
  0x9f   : > { %1943 = vmatmul.mubr.msk.f32.vlgmr.msra.gmra.mrb[6].mxu0 %vm272_vm1, %v956_v26  ;;  %2103 = vset.pattern.permute.xlu1 %v2209_v10 }
  0xa0   : > { %1951 = vmatpush3.msk.msra.mxu0 %vm279_vm0, %v2281_v0  ;;  %1485 = vperm.xlu1 %2103, %v2318_v5  }
  0xa1   : > { %v1069_v27 = vpop.permute.xlu0 %1068  ;;  %v1071_v28 = vpop.permute.xlu1 %1070 }
  0xa2   : > { %1947 = vmatprep.mubr.msk.f32.mxu1 %vm272_vm1, %v1069_v27 }
  0xa3   : > { %1948 = vmatmul.mubr.msk.f32.vlgmr.msra.gmra.mrb[6].mxu1 %vm272_vm1, %v1071_v28 }
  0xa4   : > { %1956 = vmatpush3.msk.msra.mxu1 %vm279_vm0, %v2281_v0  ;;  %2104 = vset.pattern.permute.xlu1 %v2212_v13 }
  0xa5   : > { %v1184_v29 = vpop.permute.xlu0 %1183  ;;  %v1186_v30 = vpop.permute.xlu1 %1185  ;;  %1577 = vperm.xlu1 %2104, %v2322_v6  }
  0xa6   : > { %1952 = vmatprep.mubr.msk.f32.mxu0 %vm272_vm1, %v1184_v29 }
  0xa7   : > { %1953 = vmatmul.mubr.msk.f32.vlgmr.msra.gmra.mrb[8].mxu0 %vm272_vm1, %v1186_v30 }
  0xa9   : > { %v1291_v31 = vpop.permute.xlu0 %1290  ;;  %v1293_v32 = vpop.permute.xlu1 %1292  ;;  %2105 = vset.pattern.permute.xlu1 %v2213_v14 }
  0xaa   : > { %1957 = vmatprep.mubr.msk.f32.mxu1 %vm272_vm1, %v1291_v31  ;;  %1625 = vperm.xlu1 %2105, %v2322_v6  }
  0xab   : > { %1958 = vmatmul.mubr.msk.f32.vlgmr.msra.gmra.mrb[8].mxu1 %vm272_vm1, %v1293_v32 }
  0xae   : > { %1630 = vperm.xlu1 %2105, %v2318_v5  }
  0xba   : > { %v2421_v33 = vpop.permute.xlu0 %932  ;;  %v370_v41 = vpop.permute.xlu1 %369 }
  0xbf   : > { %v2429_v35 = vpop.permute.xlu0 %1272  ;;  %v473_v46 = vpop.permute.xlu1 %472 }
  0xc4   : > { %v365_v44 = vpop.permute.xlu0 %364  ;;  %v594_v47 = vpop.permute.xlu1 %593 }
  0xc8   : > { %v2439_v48 = vpop.permute.xlu0 %1405 }
  0xc9   : > { %v2441_v49 = vpop.permute.xlu1 %704 }
  0xcd   : > { %v2443_v50 = vpop.permute.xlu0 %820 }
  0xce   : > { %v826_v51 = vpop.permute.xlu1 %825 }
  0xd1   : > { %v2445_v52 = vpop.permute.xlu0 %1510 }
  0xd3   : > { %v2447_v53 = vpop.permute.xlu1 %927 }
  0xd6   : > { %v478_v54 = vpop.permute.xlu0 %477 }
  0xd8   : > { %v2449_v55 = vpop.permute.xlu1 %1047 }
  0xda   : > { %v2451_v56 = vpop.permute.xlu0 %1435 }
  0xdd   : > { %v2453_v57 = vpop.permute.xlu1 %1157 }
  0xdf   : > { %v589_v58 = vpop.permute.xlu0 %588 }
  0xe2   : > { %v2455_v59 = vpop.permute.xlu1 %1277 }
  0xe3   : > { %v2457_v60 = vpop.permute.xlu0 %1455 }
  0xe7   : > { %v2459_v61 = vpop.permute.xlu1 %1379 }
  0xe8   : > { %v2461_v62 = vpop.permute.xlu0 %1042 }
  0xec   : > { %v1914_v36 = vpop.f32.mrb[0].mxu0  ;;  %v2465_v7 = vpop.permute.xlu1 %1410 }
  0xed   : > { %v355_v37 = vadd.f32 %v1914_v36, %v2427_v34  ;;  %v349_v38 = vpop.f32.mrb[1].mxu0  ;;  %v2472_v23 = vpop.permute.xlu0 %1558 }
  0xee   : > { %v350_v39 = vadd.f32 %v2427_v34, %v349_v38 }
  0xef   : > { %v359_v40 = vmax.f32 %v355_v37, 0.0 }
  0xf0   : > { %v358_v42 = vmax.f32 %v350_v39, 0.0 }
  0xf1   : > { %v373_v43 = vmul.f32 %v370_v41, %v359_v40  ;;  %v378_v1 = vmax.f32 %v359_v40, 0.0  ;;  %v2475_v24 = vpop.permute.xlu1 %1505  ;;  %v710_v41 = vpop.permute.xlu0 %709 }
  0xf2   : > { %v372_v45 = vmul.f32 %v365_v44, %v358_v42  ;;  %v377_v6 = vmax.f32 %v358_v42, 0.0 }
  0xf3   : > { %376 = vst.msk [vmem:[%s2433_s15 + $0x18] sm:$0xff] %vm374_vm2, %v373_v43 }
  0xf4   : > { %375 = vst.msk [vmem:[%s2433_s15] sm:$0xff] %vm374_vm2, %v372_v45 }
  0xf6   : > { %v2480_v43 = vpop.permute.xlu1 %1384 }
 0x161   : > { %v1919_v63 = vpop.f32.mrb[0].mxu1  ;;  %v1924_v0 = vpop.f32.mrb[2].mxu0 }
 0x162   : > { %v463_v2 = vadd.f32 %v1919_v63, %v2427_v34  ;;  %v579_v3 = vadd.f32 %v1924_v0, %v2427_v34  ;;  %v457_v4 = vpop.f32.mrb[1].mxu1  ;;  %v573_v5 = vpop.f32.mrb[3].mxu0 }
 0x163   : > { %v458_v8 = vadd.f32 %v2427_v34, %v457_v4  ;;  %v574_v9 = vadd.f32 %v2427_v34, %v573_v5 }
 0x164   : > { %v467_v10 = vmax.f32 %v463_v2, 0.0  ;;  %v583_v11 = vmax.f32 %v579_v3, 0.0 }
 0x165   : > { %v466_v12 = vmax.f32 %v458_v8, 0.0  ;;  %v582_v18 = vmax.f32 %v574_v9, 0.0  ;;  %v2493_v8 = vpop.permute.xlu1 %1430 }
 0x166   : > { %v481_v13 = vmul.f32 %v478_v54, %v467_v10  ;;  %v494_v14 = vmax.f32 %v378_v1, %v467_v10  ;;  %v597_v15 = vmul.f32 %v594_v47, %v583_v11  ;;  %v1929_v16 = vpop.f32.mrb[2].mxu1 }
 0x167   : > { %v493_v17 = vmax.f32 %v377_v6, %v466_v12  ;;  %v695_v19 = vadd.f32 %v1929_v16, %v2427_v34  ;;  %v689_v20 = vpop.f32.mrb[3].mxu1  ;;  %v480_v27 = vmul.f32 %v473_v46, %v466_v12  ;;  %v596_v39 = vmul.f32 %v589_v58, %v582_v18 }
 0x168   : > { %v610_v21 = vmax.f32 %v494_v14, %v583_v11  ;;  %v690_v22 = vadd.f32 %v2427_v34, %v689_v20  ;;  %486 = vrot.lane.b32.xlu1 %v481_v13, %s2214_s29  ;;  %602 = vrot.lane.b32.xlu0 %v597_v15, %s2215_s30 }
 0x169   : > { %v609_v25 = vmax.f32 %v493_v17, %v582_v18  ;;  %v699_v26 = vmax.f32 %v695_v19, 0.0 }
 0x16a   : > { %v698_v28 = vmax.f32 %v690_v22, 0.0  ;;  %v1934_v29 = vpop.f32.mrb[4].mxu0  ;;  %v1530_v22 = vpop.permute.xlu1 %1529 }
 0x16b   : > { %v726_v30 = vmax.f32 %v610_v21, %v699_v26  ;;  %v811_v31 = vadd.f32 %v1934_v29, %v2427_v34  ;;  %v805_v32 = vpop.f32.mrb[5].mxu0  ;;  %v713_v0 = vmul.f32 %v710_v41, %v699_v26 }
 0x16c   : > { %v725_v36 = vmax.f32 %v609_v25, %v698_v28  ;;  %v806_v37 = vadd.f32 %v2427_v34, %v805_v32  ;;  %484 = vrot.lane.b32.xlu1 %v480_v27, %s2214_s29  ;;  %v712_v10 = vmul.f32 %v2441_v49, %v698_v28 }
 0x16d   : > { %v815_v38 = vmax.f32 %v811_v31, 0.0 }
 0x16e   : > { %v814_v40 = vmax.f32 %v806_v37, 0.0  ;;  %v1939_v42 = vpop.f32.mrb[4].mxu1 }
 0x16f   : > { %v829_v44 = vmul.f32 %v826_v51, %v815_v38  ;;  %v833_v45 = vmax.f32 %v726_v30, %v815_v38  ;;  %v918_v46 = vadd.f32 %v1939_v42, %v2427_v34  ;;  %v912_v47 = vpop.f32.mrb[5].mxu1 }
 0x170   : > { %v828_v54 = vmul.f32 %v2443_v50, %v814_v40  ;;  %v832_v63 = vmax.f32 %v725_v36, %v814_v40  ;;  %v913_v1 = vadd.f32 %v2427_v34, %v912_v47  ;;  %600 = vrot.lane.b32.xlu1 %v596_v39, %s2215_s30 }
 0x171   : > { %v922_v58 = vmax.f32 %v918_v46, 0.0  ;;  %831 = vst.msk [vmem:[%s2433_s15 + $0x20] sm:$0xff] %vm374_vm2, %v829_v44  ;;  %v1535_v44 = vpop.permute.xlu1 %1534 }
 0x172   : > { %v921_v2 = vmax.f32 %v913_v1, 0.0  ;;  %v1944_v3 = vpop.f32.mrb[6].mxu0  ;;  %830 = vst.msk [vmem:[%s2433_s15 + $0x8] sm:$0xff] %vm374_vm2, %v828_v54 }
 0x173   : > { %v948_v51 = vmax.f32 %v833_v45, %v922_v58  ;;  %v1033_v4 = vadd.f32 %v1944_v3, %v2427_v34  ;;  %v1027_v5 = vpop.f32.mrb[7].mxu0  ;;  %v936_v20 = vmul.f32 %v2421_v33, %v922_v58  ;;  %v1481_v33 = vpop.permute.xlu0 %1480 }
 0x174   : > { %v947_v6 = vmax.f32 %v832_v63, %v921_v2  ;;  %v1028_v50 = vadd.f32 %v2427_v34, %v1027_v5  ;;  %718 = vrot.lane.b32.xlu1 %v713_v0, %s2216_s5  ;;  %v935_v30 = vmul.f32 %v2447_v53, %v921_v2 }
 0x175   : > { %v1037_v9 = vmax.f32 %v1033_v4, 0.0  ;;  %v1461_v0 = vpop.permute.xlu1 %1460 }
 0x176   : > { %v1036_v11 = vmax.f32 %v1028_v50, 0.0  ;;  %v1949_v12 = vpop.f32.mrb[6].mxu1 }
 0x177   : > { %v1051_v13 = vmul.f32 %v2449_v55, %v1037_v9  ;;  %v1063_v14 = vmax.f32 %v948_v51, %v1037_v9  ;;  %v1148_v15 = vadd.f32 %v1949_v12, %v2427_v34  ;;  %v1142_v16 = vpop.f32.mrb[7].mxu1  ;;  %v1163_v47 = vpop.permute.xlu0 %1162 }
 0x178   : > { %v1062_v17 = vmax.f32 %v947_v6, %v1036_v11  ;;  %v1143_v18 = vadd.f32 %v2427_v34, %v1142_v16  ;;  %716 = vrot.lane.b32.xlu1 %v712_v10, %s2216_s5  ;;  %v1050_v53 = vmul.f32 %v2461_v62, %v1036_v11 }
 0x179   : > { %v1152_v19 = vmax.f32 %v1148_v15, 0.0  ;;  %1056 = vrot.lane.b32.xlu0 %v1051_v13, %s2215_s30  ;;  %v1554_v58 = vpop.permute.xlu1 %1553 }
 0x17a   : > { %v1151_v21 = vmax.f32 %v1143_v18, 0.0  ;;  %v1954_v49 = vpop.f32.mrb[8].mxu0 }
 0x17b   : > { %v1178_v25 = vmax.f32 %v1063_v14, %v1152_v19  ;;  %v1263_v55 = vadd.f32 %v1954_v49, %v2427_v34  ;;  %v1257_v26 = vpop.f32.mrb[9].mxu0  ;;  %v1166_v63 = vmul.f32 %v1163_v47, %v1152_v19  ;;  %v1583_v14 = vpop.permute.xlu0 %1582 }
 0x17c   : > { %v1177_v27 = vmax.f32 %v1062_v17, %v1151_v21  ;;  %v1258_v28 = vadd.f32 %v2427_v34, %v1257_v26  ;;  %941 = vrot.lane.b32.xlu1 %v936_v20, %s2214_s29  ;;  %v1165_v1 = vmul.f32 %v2453_v57, %v1151_v21 }
 0x17d   : > { %v1267_v29 = vmax.f32 %v1263_v55, 0.0  ;;  %v1602_v57 = vpop.permute.xlu1 %1601 }
 0x17e   : > { %v1266_v31 = vmax.f32 %v1258_v28, 0.0  ;;  %v1959_v32 = vpop.f32.mrb[8].mxu1 }
 0x17f   : > { %v1281_v36 = vmul.f32 %v2455_v59, %v1267_v29  ;;  %v1285_v37 = vmax.f32 %v1178_v25, %v1267_v29  ;;  %v1370_v38 = vadd.f32 %v1959_v32, %v2427_v34  ;;  %v1364_v39 = vpop.f32.mrb[9].mxu1 }
 0x180   : > { %v1280_v40 = vmul.f32 %v2429_v35, %v1266_v31  ;;  %v1284_v41 = vmax.f32 %v1177_v27, %v1266_v31  ;;  %v1365_v42 = vadd.f32 %v2427_v34, %v1364_v39  ;;  %939 = vrot.lane.b32.xlu1 %v935_v30, %s2214_s29 }
 0x181   : > { %v1374_v45 = vmax.f32 %v1370_v38, 0.0  ;;  %1283 = vst.msk [vmem:[%s2433_s15 + $0x28] sm:$0xff] %vm374_vm2, %v1281_v36 }
 0x182   : > { %v1373_v46 = vmax.f32 %v1365_v42, 0.0  ;;  %1282 = vst.msk [vmem:[%s2433_s15 + $0x10] sm:$0xff] %vm374_vm2, %v1280_v40 }
 0x183   : > { %v2516_v59 = vmax.f32 %v1285_v37, %v1374_v45  ;;  %v1388_v2 = vmul.f32 %v2480_v43, %v1374_v45  ;;  %v1607_v43 = vpop.permute.xlu1 %1606 }
 0x184   : > { %v1387_v54 = vmul.f32 %v2459_v61, %v1373_v46  ;;  %v1399_v35 = vmax.f32 %v1284_v41, %v1373_v46  ;;  %1054 = vrot.lane.b32.xlu1 %v1050_v53, %s2215_s30 }
 0x185   : > { %v1514_v34 = vmul.f32 %v2445_v52, %v2516_v59  ;;  %v1439_v51 = vmul.f32 %v2451_v56, %v2516_v59  ;;  %v1562_v56 = vmul.f32 %v2472_v23, %v2516_v59  ;;  %v1610_v10 = vmul.f32 %v1607_v43, %v2516_v59 }
 0x186   : > { %1391 = vrot.lane.b32.xlu0 %v1387_v54, %s2214_s29  ;;  %v1413_v62 = vmul.f32 %v2439_v48, %v1399_v35  ;;  %v1513_v61 = vmul.f32 %v2475_v24, %v1399_v35  ;;  %v1438_v52 = vmul.f32 %v2493_v8, %v1399_v35  ;;  %v1414_v48 = vmul.f32 %v2465_v7, %v2516_v59 }
 0x187   : > { %v1537_v3 = vmul.f32 %v1530_v22, %v1399_v35  ;;  %v1463_v24 = vmul.f32 %v2457_v60, %v1399_v35  ;;  %v1561_v4 = vmul.f32 %v1554_v58, %v1399_v35  ;;  %v1538_v7 = vmul.f32 %v1535_v44, %v2516_v59  ;;  %v1486_v5 = vpop.permute.xlu1 %1485 }
 0x188   : > { %1171 = vrot.lane.b32.xlu1 %v1166_v63, %s2216_s5  ;;  %v1609_v6 = vmul.f32 %v1602_v57, %v1399_v35  ;;  %v1464_v60 = vmul.f32 %v1461_v0, %v2516_v59  ;;  %v1488_v50 = vmul.f32 %v1481_v33, %v1399_v35  ;;  %v1489_v13 = vmul.f32 %v1486_v5, %v2516_v59 }
 0x189   : > { %v1586_v23 = vmul.f32 %v1583_v14, %v2516_v59 }
 0x18a   : > { %1417 = vrot.lane.b32.xlu0 %v1413_v62, %s2217_s6 }
 0x18b   : > { %v1578_v8 = vpop.permute.xlu1 %1577 }
 0x18c   : > { %1169 = vrot.lane.b32.xlu1 %v1165_v1, %s2216_s5  ;;  %v1585_v9 = vmul.f32 %v1578_v8, %v1399_v35 }
 0x18e   : > { %1517 = vrot.lane.b32.xlu0 %v1513_v61, %s2217_s6 }
 0x18f   : > { %v1626_v11 = vpop.permute.xlu1 %1625 }
 0x190   : > { %1393 = vrot.lane.b32.xlu1 %v1388_v2, %s2214_s29  ;;  %v1633_v12 = vmul.f32 %v1626_v11, %v1399_v35 }
 0x192   : > { %1442 = vrot.lane.b32.xlu0 %v1438_v52, %s2218_s7 }
 0x193   : > { %v1631_v15 = vpop.permute.xlu1 %1630 }
 0x194   : > { %1419 = vrot.lane.b32.xlu1 %v1414_v48, %s2217_s6  ;;  %v1634_v16 = vmul.f32 %v1631_v15, %v2516_v59 }
 0x196   : > { %1541 = vrot.lane.b32.xlu0 %v1537_v3, %s2218_s7 }
 0x198   : > { %1519 = vrot.lane.b32.xlu1 %v1514_v34, %s2217_s6 }
 0x19a   : > { %1467 = vrot.lane.b32.xlu0 %v1463_v24, %s2219_s8 }
 0x19c   : > { %1444 = vrot.lane.b32.xlu1 %v1439_v51, %s2218_s7 }
 0x19e   : > { %1565 = vrot.lane.b32.xlu0 %v1561_v4, %s2219_s8 }
 0x1a0   : > { %1543 = vrot.lane.b32.xlu1 %v1538_v7, %s2218_s7 }
 0x1a2   : > { %1613 = vrot.lane.b32.xlu0 %v1609_v6, %s2217_s6 }
 0x1a4   : > { %1469 = vrot.lane.b32.xlu1 %v1464_v60, %s2219_s8 }
 0x1a6   : > { %1492 = vrot.lane.b32.xlu0 %v1488_v50, %s2220_s9 }
 0x1a8   : > { %1567 = vrot.lane.b32.xlu1 %v1562_v56, %s2219_s8 }
 0x1aa   : > { %1589 = vrot.lane.b32.xlu0 %v1585_v9, %s2220_s9 }
 0x1ac   : > { %1615 = vrot.lane.b32.xlu1 %v1610_v10, %s2217_s6 }
 0x1ae   : > { %1637 = vrot.lane.b32.xlu0 %v1633_v12, %s2218_s7 }
 0x1b0   : > { %1494 = vrot.lane.b32.xlu1 %v1489_v13, %s2220_s9 }
 0x1b4   : > { %1591 = vrot.lane.b32.xlu1 %v1586_v23, %s2220_s9 }
 0x1b8   : > { %1639 = vrot.lane.b32.xlu1 %v1634_v16, %s2218_s7 }
 0x1da   : > { %v487_v17 = vpop.permute.xlu1 %486  ;;  %v603_v18 = vpop.permute.xlu0 %602 }
 0x1db   : > { %492 = vst.msk [vmem:[%s2433_s15 + $0x18] sm:$0xff] %vm490_vm3, %v487_v17 }
 0x1dc   : > { %608 = vst.msk [vmem:[%s2433_s15 + $0x18] sm:$0xff] %vm606_vm4, %v603_v18 }
 0x1de   : > { %v485_v19 = vpop.permute.xlu1 %484 }
 0x1df   : > { %491 = vst.msk [vmem:[%s2433_s15] sm:$0xff] %vm490_vm3, %v485_v19 }
 0x1e2   : > { %v601_v20 = vpop.permute.xlu1 %600 }
 0x1e3   : > { %607 = vst.msk [vmem:[%s2433_s15] sm:$0xff] %vm606_vm4, %v601_v20 }
 0x1e6   : > { %v719_v21 = vpop.permute.xlu1 %718 }
 0x1e7   : > { %724 = vst.msk [vmem:[%s2433_s15 + $0x18] sm:$0xff] %vm722_vm5, %v719_v21 }
 0x1ea   : > { %v717_v49 = vpop.permute.xlu1 %716 }
 0x1eb   : > { %723 = vst.msk [vmem:[%s2433_s15] sm:$0xff] %vm722_vm5, %v717_v49  ;;  %v1057_v25 = vpop.permute.xlu0 %1056 }
 0x1ee   : > { %v942_v22 = vpop.permute.xlu1 %941 }
 0x1ef   : > { %946 = vst.msk [vmem:[%s2433_s15 + $0x20] sm:$0xff] %vm490_vm3, %v942_v22 }
 0x1f0   : > { %1061 = vst.msk [vmem:[%s2433_s15 + $0x20] sm:$0xff] %vm606_vm4, %v1057_v25 }
 0x1f2   : > { %v940_v55 = vpop.permute.xlu1 %939 }
 0x1f3   : > { %945 = vst.msk [vmem:[%s2433_s15 + $0x8] sm:$0xff] %vm490_vm3, %v940_v55 }
 0x1f6   : > { %v1055_v26 = vpop.permute.xlu1 %1054 }
 0x1f7   : > { %1060 = vst.msk [vmem:[%s2433_s15 + $0x8] sm:$0xff] %vm606_vm4, %v1055_v26 }
 0x1f8   : > { %v1392_v27 = vpop.permute.xlu0 %1391 }
 0x1f9   : > { %1397 = vst.msk [vmem:[%s2433_s15 + $0x10] sm:$0xff] %vm490_vm3, %v1392_v27 }
 0x1fa   : > { %v1172_v28 = vpop.permute.xlu1 %1171 }
 0x1fb   : > { %1176 = vst.msk [vmem:[%s2433_s15 + $0x20] sm:$0xff] %vm722_vm5, %v1172_v28 }
 0x1fc   : > { %v1418_v29 = vpop.permute.xlu0 %1417 }
 0x1fd   : > { %1424 = vst.msk [vmem:[%s2433_s15] sm:$0xff] %vm1423_vm6, %v1418_v29 }
 0x1fe   : > { %v1170_v30 = vpop.permute.xlu1 %1169 }
 0x1ff   : > { %1175 = vst.msk [vmem:[%s2433_s15 + $0x8] sm:$0xff] %vm722_vm5, %v1170_v30 }
 0x200   : > { %v1518_v31 = vpop.permute.xlu0 %1517 }
 0x201   : > { %1523 = vst.msk [vmem:[%s2433_s15 + $0x8] sm:$0xff] %vm1423_vm6, %v1518_v31 }
 0x202   : > { %v1394_v32 = vpop.permute.xlu1 %1393 }
 0x203   : > { %1398 = vst.msk [vmem:[%s2433_s15 + $0x28] sm:$0xff] %vm490_vm3, %v1394_v32 }
 0x204   : > { %v1443_v33 = vpop.permute.xlu0 %1442 }
 0x205   : > { %1449 = vst.msk [vmem:[%s2433_s15] sm:$0xff] %vm1448_vm7, %v1443_v33 }
 0x206   : > { %v1420_v36 = vpop.permute.xlu1 %1419 }
 0x207   : > { %1425 = vst.msk [vmem:[%s2433_s15 + $0x18] sm:$0xff] %vm1423_vm6, %v1420_v36 }
 0x208   : > { %v1542_v37 = vpop.permute.xlu0 %1541 }
 0x209   : > { %1547 = vst.msk [vmem:[%s2433_s15 + $0x8] sm:$0xff] %vm1448_vm7, %v1542_v37 }
 0x20a   : > { %v1520_v38 = vpop.permute.xlu1 %1519 }
 0x20b   : > { %1524 = vst.msk [vmem:[%s2433_s15 + $0x20] sm:$0xff] %vm1423_vm6, %v1520_v38 }
 0x20c   : > { %v1468_v39 = vpop.permute.xlu0 %1467 }
 0x20d   : > { %1474 = vst.msk [vmem:[%s2433_s15] sm:$0xff] %vm1473_vm8, %v1468_v39 }
 0x20e   : > { %v1445_v40 = vpop.permute.xlu1 %1444 }
 0x20f   : > { %1450 = vst.msk [vmem:[%s2433_s15 + $0x18] sm:$0xff] %vm1448_vm7, %v1445_v40 }
 0x210   : > { %v1566_v41 = vpop.permute.xlu0 %1565 }
 0x211   : > { %1571 = vst.msk [vmem:[%s2433_s15 + $0x8] sm:$0xff] %vm1473_vm8, %v1566_v41 }
 0x212   : > { %v1544_v42 = vpop.permute.xlu1 %1543 }
 0x213   : > { %1548 = vst.msk [vmem:[%s2433_s15 + $0x20] sm:$0xff] %vm1448_vm7, %v1544_v42 }
 0x214   : > { %v1614_v44 = vpop.permute.xlu0 %1613 }
 0x215   : > { %1619 = vst.msk [vmem:[%s2433_s15 + $0x10] sm:$0xff] %vm1423_vm6, %v1614_v44 }
 0x216   : > { %v1470_v45 = vpop.permute.xlu1 %1469 }
 0x217   : > { %1475 = vst.msk [vmem:[%s2433_s15 + $0x18] sm:$0xff] %vm1473_vm8, %v1470_v45 }
 0x218   : > { %v1493_v53 = vpop.permute.xlu0 %1492 }
 0x219   : > { %1499 = vst.msk [vmem:[%s2433_s15] sm:$0xff] %vm1498_vm9, %v1493_v53 }
 0x21a   : > { %v1568_v46 = vpop.permute.xlu1 %1567 }
 0x21b   : > { %1572 = vst.msk [vmem:[%s2433_s15 + $0x20] sm:$0xff] %vm1473_vm8, %v1568_v46 }
 0x21c   : > { %v1590_v59 = vpop.permute.xlu0 %1589 }
 0x21d   : > { %1595 = vst.msk [vmem:[%s2433_s15 + $0x8] sm:$0xff] %vm1498_vm9, %v1590_v59 }
 0x21e   : > { %v1616_v47 = vpop.permute.xlu1 %1615 }
 0x21f   : > { %1620 = vst.msk [vmem:[%s2433_s15 + $0x28] sm:$0xff] %vm1423_vm6, %v1616_v47 }
 0x220   : > { %v1638_v54 = vpop.permute.xlu0 %1637 }
 0x221   : > { %1643 = vst.msk [vmem:[%s2433_s15 + $0x10] sm:$0xff] %vm1448_vm7, %v1638_v54 }
 0x222   : > { %v1495_v35 = vpop.permute.xlu1 %1494 }
 0x223   : > { %1500 = vst.msk [vmem:[%s2433_s15 + $0x18] sm:$0xff] %vm1498_vm9, %v1495_v35 }
 0x225   : > { %1651 = sbr.rel (!%p2271_p4) target bundleno = 605 (0x25d), region = 40 }
 0x226   : > { %v1592_v63 = vpop.permute.xlu1 %1591 }
 0x227   : > { %1596 = vst.msk [vmem:[%s2433_s15 + $0x20] sm:$0xff] %vm1498_vm9, %v1592_v63 }
 0x22a   : > { %v1640_v34 = vpop.permute.xlu1 %1639 }
 0x22b   : > { %1644 = vst.msk [vmem:[%s2433_s15 + $0x28] sm:$0xff] %vm1448_vm7, %v1640_v34 }
 0x22c   : > { %s2708_s10 = smov (!%p1654_p8, %s1653_s10), 2 }
 0x22d   : > { %s1868_s17 = smul.u32 384, %s2708_s10 }
 0x22f   : > { %p1872_p9 = scmp.eq.s32.totalorder %s1868_s17, 0 }
 0x230   : > { %s2633_s20 = sshrl.u32 (!%p1872_p9), %s2708_s10, 1 }
 0x231   : > { %1664 = sbr.rel (%p1872_p9) target bundleno = 605 (0x25d), region = 44  ;;  %p1873_p10 = scmp.le.s32.totalorder (!%p1872_p9), %s2633_s20, 0 }
 0x238   : > { %1777 = sbr.rel (%p1873_p10) target bundleno = 585 (0x249), region = 95  ;;  %s2700_s18 = smov (!%p1873_p10), %s2627_s14 }
 0x239   : > { %s2701_s23 = smov (!%p1873_p10), %s2433_s15  ;;  %s2642_s24 = smov (!%p1873_p10), 0  }
 0x23a   : > { %s2644_s21 = smov (!%p1873_p10), 0  }
 0x23f LB: >> { %v1677_v0 = vld [vmem:[%s2169_s23] sm:$0xff]  ;;  %v1679_v62 = vld [vmem:[%s2169_s23 + $0x18] sm:$0xff]  ;;  %v1681_v1 = vld [vmem:[%s2169_s23 + $0x8] sm:$0xff]  ;;  %s1689_s25 = sadd.s32 1, %s2173_s24  ;;  %s1671_s21 = sadd.s32 1, %s2177_s21   ;;  %s2177_s21 = sphi %s2644_s21, %s1671_s21   ;;  %s2173_s24 = sphi %s2642_s24, %s2702_s24   ;;  %s2169_s23 = sphi %s2701_s23, %s1694_s23   ;;  %s2165_s18 = sphi %s2700_s18, %s1695_s18  }
 0x240   : >> { %1678 = vst [vmem:[%s2165_s18] sm:$0xff] %v1677_v0  ;;  %1680 = vst [vmem:[%s2165_s18 + $0x18] sm:$0xff] %v1679_v62  ;;  %v1683_v61 = vld [vmem:[%s2169_s23 + $0x20] sm:$0xff]  ;;  %v1685_v58 = vld [vmem:[%s2169_s23 + $0x10] sm:$0xff]  ;;  %p1690_p11 = scmp.ge.s32.totalorder %s1689_s25, %s2633_s20  ;;  %p1670_p12 = scmp.ge.s32.totalorder %s1671_s21, %s2633_s20 }
 0x241   : >> { %1682 = vst [vmem:[%s2165_s18 + $0x8] sm:$0xff] %v1681_v1  ;;  %v1687_v2 = vld [vmem:[%s2169_s23 + $0x28] sm:$0xff]  ;;  %1684 = vst [vmem:[%s2165_s18 + $0x20] sm:$0xff] %v1683_v61 }
 0x242   : >> { %1686 = vst [vmem:[%s2165_s18 + $0x10] sm:$0xff] %v1685_v58  ;;  %1688 = vst [vmem:[%s2165_s18 + $0x28] sm:$0xff] %v1687_v2  ;;  %s2710_s25 = smov (%p1690_p11, %s1689_s25), 0  ;;  %1673 = sbr.rel (!%p1670_p12) target bundleno = 575 (0x23f), region = 101 }
 0x243   : >> { %s1692_s26 = smul.u32 48, %s2710_s25  ;;  %s2702_s24 = smov %s2710_s25 }
 0x245   : >> { %s1694_s23 = scalar_lea.vmem %s2433_s15, %s1692_s26 [#allocation2]   ;;  %s1695_s18 = scalar_lea.vmem %s2627_s14, %s1692_s26  }
 0x249 PF: > { %s2663_s27 = sand.u32 1, %s2708_s10   ;;  %s1875_s28 = smul.u32 48, %s2633_s20 }
 0x24a   : > { %p1877_p13 = scmp.le.s32.totalorder %s2663_s27, 0 }
 0x24b   : > { %s2667_s29 = scalar_lea.vmem %s2433_s15, %s1875_s28 [#allocation2]   ;;  %s2670_s30 = scalar_lea.vmem %s2627_s14, %s1875_s28  }
 0x24c   : > { %1791 = sbr.rel (%p1877_p13) target bundleno = 605 (0x25d), region = 106  ;;  %s2703_s5 = smov (!%p1877_p13), %s2670_s30 }
 0x24d   : > { %s2183_s6 = smov (!%p1877_p13), %s2667_s29   ;;  %s2187_s7 = smov (!%p1877_p13), 0  }
 0x24e   : > { %s2191_s8 = smov (!%p1877_p13), 0  }
 0x253 LB: >> { %v1712_v52 = vld [vmem:[%s2185_s6] sm:$0xff]  ;;  %v1714_v48 = vld [vmem:[%s2185_s6 + $0x8] sm:$0xff]  ;;  %v1716_v57 = vld [vmem:[%s2185_s6 + $0x10] sm:$0xff]  ;;  %s1718_s15 = sadd.s32 1, %s2189_s7  ;;  %s1706_s8 = sadd.s32 1, %s2193_s8   ;;  %s2193_s8 = sphi %s2191_s8, %s1706_s8   ;;  %s2189_s7 = sphi %s2187_s7, %s2188_s7   ;;  %s2185_s6 = sphi %s2183_s6, %s1723_s6   ;;  %s2181_s5 = sphi %s2703_s5, %s1724_s5  }
 0x254   : >> { %1713 = vst [vmem:[%s2181_s5] sm:$0xff] %v1712_v52  ;;  %1715 = vst [vmem:[%s2181_s5 + $0x8] sm:$0xff] %v1714_v48  ;;  %p1719_p0 = scmp.ge.s32.totalorder %s1718_s15, %s2663_s27  ;;  %p1705_p1 = scmp.ge.s32.totalorder %s1706_s8, %s2663_s27 }
 0x255   : >> { %1717 = vst [vmem:[%s2181_s5 + $0x10] sm:$0xff] %v1716_v57 }
 0x256   : >> { %s2712_s15 = smov (%p1719_p0, %s1718_s15), 0  ;;  %1708 = sbr.rel (!%p1705_p1) target bundleno = 595 (0x253), region = 112 }
 0x257   : >> { %s1721_s9 = smul.u32 24, %s2712_s15  ;;  %s2188_s7 = smov %s2712_s15  }
 0x259   : >> { %s1723_s6 = scalar_lea.vmem %s2667_s29, %s1721_s9 [#allocation2]   ;;  %s1724_s5 = scalar_lea.vmem %s2670_s30, %s1721_s9  }
 0x25d PF: > { %p11_p2 = scmp.ge.s32.totalorder %s2261_s19, 6   ;;  %s2704_s15 = smov %s2157_s16 }
 0x25e   : > { %s2705_s16 = smov %s2269_s22  ;;  %s2706_s17 = smov %s2261_s19 }
 0x25f   :  { %13 = sbr.rel (!%p11_p2) target bundleno = 2 (0x2), region = 123 }

</bundles_post_ra>
